<compile_context>
chip_gen: v7x
topology: tpu7x:2x2x1
jax: 0.10.0
libtpu: 0.0.40
codegen_flags: <defaults>
</compile_context>

<pallas_src>
import functools

import jax
import jax.numpy as jnp
from jax import lax
from jax.experimental import pallas as pl
from jax.experimental.pallas import tpu as pltpu


# ----------------------------------------------------------------------------- generation-aware config
def _vmem_capacity_bytes():
    try:
        return int(pltpu.get_tpu_info().vmem_capacity_bytes)
    except Exception:
        return 64 << 20  # conservative fallback (v7x-sized) -> safe tiling everywhere


_VMEM_CAP = _vmem_capacity_bytes()
_IS_SMALL_VMEM = _VMEM_CAP <= (64 << 20)          # v7x: 64 MiB/TC, v5e/v6e: 128 MiB
_MM_TILE_CAP = 256 if _IS_SMALL_VMEM else 512     # linear tm/tn caps
_MM_VMEM_LIMIT = (28 << 20) if _IS_SMALL_VMEM else (48 << 20)
_EW_VMEM_LIMIT = (24 << 20) if _IS_SMALL_VMEM else (32 << 20)


def _pick_tile(dim, cap):
    """Largest lane/sublane-friendly tile <= cap that divides dim (or the full dim if small)."""
    if dim <= cap:
        return dim
    for t in (cap, 512, 384, 256, 128):
        if t <= cap and dim % t == 0:
            return t
    return cap  # ragged edge blocks are masked by Pallas on store (K stays un-tiled)


# ----------------------------------------------------------------------------- matmul + bias (+GELU) (+residual)
def _matmul_bias_kernel(x_ref, w_ref, b_ref, *rest, activation, has_residual):
    if has_residual:
        r_ref, o_ref = rest
    else:
        (o_ref,) = rest
    # bf16 operands, f32 MXU accumulation. Weight is consumed in PyTorch (out,in) layout via
    # a last-dim/last-dim contraction (MXU-native transposed RHS, no per-tile XLU transpose).
    acc = lax.dot_general(
        x_ref[...].astype(jnp.bfloat16),
        w_ref[...].astype(jnp.bfloat16),
        dimension_numbers=(((1,), (1,)), ((), ())),
        preferred_element_type=jnp.float32,
    )
    acc = acc + b_ref[...].astype(jnp.float32)
    if activation == "gelu_tanh":
        # TODO(synk): nn.GELU() is erf-exact; tanh approximation used for guaranteed Mosaic
        # lowering (max abs deviation ~3e-4). The reference below uses the same formula.
        c = 0.7978845608028654  # sqrt(2/pi)
        acc = 0.5 * acc * (1.0 + jnp.tanh(c * (acc + 0.044715 * acc * acc * acc)))
    if has_residual:
        acc = acc + r_ref[...].astype(jnp.float32)
    o_ref[...] = acc.astype(o_ref.dtype)


def linear(x2d, w, b, activation=None, residual=None):
    """y = x2d @ w.T + b [+ gelu] [+ residual]   (w in PyTorch (out_features, in_features))."""
    M, K = x2d.shape
    NO, K2 = w.shape
    assert K == K2
    tm = _pick_tile(M, _MM_TILE_CAP)
    tn = _pick_tile(NO, _MM_TILE_CAP)
    grid = (pl.cdiv(M, tm), pl.cdiv(NO, tn))
    # NOTE on operand reuse: with j innermost the weight is re-streamed M/tm times; tm is
    # grown toward the VMEM cap so the activation tile held across the j sweep amortizes it.
    in_specs = [
        pl.BlockSpec((tm, K), lambda i, j: (i, 0)),
        pl.BlockSpec((tn, K), lambda i, j: (j, 0)),
        pl.BlockSpec((1, tn), lambda i, j: (0, j)),
    ]
    args = [x2d, w, b.reshape(1, NO)]
    if residual is not None:
        in_specs.append(pl.BlockSpec((tm, tn), lambda i, j: (i, j)))
        args.append(residual)
    kernel = functools.partial(
        _matmul_bias_kernel, activation=activation, has_residual=residual is not None
    )
    cost = pl.CostEstimate(
        flops=2 * M * K * NO,
        transcendentals=(M * NO if activation == "gelu_tanh" else 0),
        bytes_accessed=4 * (M * K + NO * K + M * NO + NO)
        + (4 * M * NO if residual is not None else 0),
    )
    return pl.pallas_call(
        kernel,
        out_shape=jax.ShapeDtypeStruct((M, NO), x2d.dtype),
        grid_spec=pltpu.PrefetchScalarGridSpec(
            num_scalar_prefetch=0,
            grid=grid,
            in_specs=in_specs,
            out_specs=pl.BlockSpec((tm, tn), lambda i, j: (i, j)),
        ),
        compiler_params=pltpu.CompilerParams(
            dimension_semantics=("parallel", "parallel"),
            vmem_limit_bytes=_MM_VMEM_LIMIT,
        ),
        cost_estimate=cost,
    )(*args)


# ----------------------------------------------------------------------------- fused LayerNorm -> ECA  (norm1+eca1)
def _ln_eca_kernel(x_ref, g_ref, b_ref, wc_ref, o_ref, *, eps):
    # x_ref: (N, D) (batch dim squeezed). LN per row, then ECA gate from the pooled LN output.
    x = x_ref[...].astype(jnp.float32)
    mu = jnp.mean(x, axis=-1, keepdims=True)
    xc = x - mu
    var = jnp.mean(xc * xc, axis=-1, keepdims=True)
    h = xc * lax.rsqrt(var + eps) * g_ref[...] + b_ref[...]          # (N, D)
    pooled = jnp.mean(h, axis=0, keepdims=True)                      # AdaptiveAvgPool1d(1) -> (1, D)
    # Conv1d(k, padding=(k-1)//2, bias=False) on a length-1 sequence == matmul with center tap.
    z = lax.dot_general(pooled.astype(jnp.bfloat16), wc_ref[...].astype(jnp.bfloat16),
                        dimension_numbers=(((1,), (1,)), ((), ())),
                        preferred_element_type=jnp.float32)          # (1, D)
    gate = jax.nn.sigmoid(z)
    o_ref[...] = (h * gate).astype(o_ref.dtype)


def ln_eca(x, gamma, beta, wc, eps=1e-5):
    # TODO(synk): per-batch full-(N, D) tile; for very large N on v7x (64 MiB VMEM) this should
    # be split into a pooled-gate pass + row-tiled apply pass.
    B, N, D = x.shape
    return pl.pallas_call(
        functools.partial(_ln_eca_kernel, eps=eps),
        out_shape=jax.ShapeDtypeStruct((B, N, D), x.dtype),
        grid_spec=pltpu.PrefetchScalarGridSpec(
            num_scalar_prefetch=0,
            grid=(B,),
            in_specs=[
                pl.BlockSpec((None, N, D), lambda b: (b, 0, 0)),
                pl.BlockSpec((1, D), lambda b: (0, 0)),
                pl.BlockSpec((1, D), lambda b: (0, 0)),
                pl.BlockSpec((D, D), lambda b: (0, 0)),
            ],
            out_specs=pl.BlockSpec((None, N, D), lambda b: (b, 0, 0)),
        ),
        compiler_params=pltpu.CompilerParams(
            dimension_semantics=("parallel",), vmem_limit_bytes=_EW_VMEM_LIMIT
        ),
    )(x, gamma.reshape(1, D), beta.reshape(1, D), wc)


# ----------------------------------------------------------------------------- fused ECA -> LayerNorm  (eca2+norm2)
def _eca_ln_kernel(x_ref, wc_ref, g_ref, b_ref, o_ref, *, eps):
    x = x_ref[...].astype(jnp.float32)                               # (N, D)
    pooled = jnp.mean(x, axis=0, keepdims=True)
    z = lax.dot_general(pooled.astype(jnp.bfloat16), wc_ref[...].astype(jnp.bfloat16),
                        dimension_numbers=(((1,), (1,)), ((), ())),
                        preferred_element_type=jnp.float32)
    xg = x * jax.nn.sigmoid(z)                                       # eca2(x)
    mu = jnp.mean(xg, axis=-1, keepdims=True)
    xc = xg - mu
    var = jnp.mean(xc * xc, axis=-1, keepdims=True)
    o_ref[...] = (xc * lax.rsqrt(var + eps) * g_ref[...] + b_ref[...]).astype(o_ref.dtype)


def eca_ln(x, wc, gamma, beta, eps=1e-5):
    B, N, D = x.shape
    return pl.pallas_call(
        functools.partial(_eca_ln_kernel, eps=eps),
        out_shape=jax.ShapeDtypeStruct((B, N, D), x.dtype),
        grid_spec=pltpu.PrefetchScalarGridSpec(
            num_scalar_prefetch=0,
            grid=(B,),
            in_specs=[
                pl.BlockSpec((None, N, D), lambda b: (b, 0, 0)),
                pl.BlockSpec((D, D), lambda b: (0, 0)),
                pl.BlockSpec((1, D), lambda b: (0, 0)),
                pl.BlockSpec((1, D), lambda b: (0, 0)),
            ],
            out_specs=pl.BlockSpec((None, N, D), lambda b: (b, 0, 0)),
        ),
        compiler_params=pltpu.CompilerParams(
            dimension_semantics=("parallel",), vmem_limit_bytes=_EW_VMEM_LIMIT
        ),
    )(x, wc, gamma.reshape(1, D), beta.reshape(1, D))


# ----------------------------------------------------------------------------- standalone ECA (eca3)
def _eca_kernel(x_ref, wc_ref, o_ref):
    x = x_ref[...].astype(jnp.float32)
    pooled = jnp.mean(x, axis=0, keepdims=True)
    z = lax.dot_general(pooled.astype(jnp.bfloat16), wc_ref[...].astype(jnp.bfloat16),
                        dimension_numbers=(((1,), (1,)), ((), ())),
                        preferred_element_type=jnp.float32)
    o_ref[...] = (x * jax.nn.sigmoid(z)).astype(o_ref.dtype)


def eca(x, wc):
    B, N, D = x.shape
    return pl.pallas_call(
        _eca_kernel,
        out_shape=jax.ShapeDtypeStruct((B, N, D), x.dtype),
        grid_spec=pltpu.PrefetchScalarGridSpec(
            num_scalar_prefetch=0,
            grid=(B,),
            in_specs=[
                pl.BlockSpec((None, N, D), lambda b: (b, 0, 0)),
                pl.BlockSpec((D, D), lambda b: (0, 0)),
            ],
            out_specs=pl.BlockSpec((None, N, D), lambda b: (b, 0, 0)),
        ),
        compiler_params=pltpu.CompilerParams(
            dimension_semantics=("parallel",), vmem_limit_bytes=_EW_VMEM_LIMIT
        ),
    )(x, wc)


# ----------------------------------------------------------------------------- attention core (all heads per step)
def _attention_kernel(qkv_ref, o_ref, *, num_heads, head_dim, scale):
    # qkv_ref: (N, 3D) per batch; heads sliced by static column offsets -> no wrapper transposes.
    D = num_heads * head_dim
    qkv = qkv_ref[...]
    for h in range(num_heads):
        q = qkv[:, h * head_dim:(h + 1) * head_dim].astype(jnp.bfloat16)
        k = qkv[:, D + h * head_dim:D + (h + 1) * head_dim].astype(jnp.bfloat16)
        v = qkv[:, 2 * D + h * head_dim:2 * D + (h + 1) * head_dim].astype(jnp.bfloat16)
        s = lax.dot_general(q, k, dimension_numbers=(((1,), (1,)), ((), ())),
                            preferred_element_type=jnp.float32) * scale        # (N, N)
        m = jnp.max(s, axis=-1, keepdims=True)
        p = jnp.exp(s - m)
        l = jnp.sum(p, axis=-1, keepdims=True)
        o = jnp.dot(p.astype(jnp.bfloat16), v, preferred_element_type=jnp.float32)
        o = o * pl.reciprocal(l, approx=True)        # deferred softmax normalization on the EUP
        o_ref[:, h * head_dim:(h + 1) * head_dim] = o.astype(o_ref.dtype)
    # TODO(synk): for large N (v7x 64 MiB VMEM) KV-tile this with an online/flash softmax
    # instead of materializing the full (N, N) score matrix.


def attention(qkv3d, num_heads, head_dim, scale):
    B, N, threeD = qkv3d.shape
    D = num_heads * head_dim
    assert threeD == 3 * D
    return pl.pallas_call(
        functools.partial(_attention_kernel, num_heads=num_heads,
                          head_dim=head_dim, scale=scale),
        out_shape=jax.ShapeDtypeStruct((B, N, D), qkv3d.dtype),
        grid_spec=pltpu.PrefetchScalarGridSpec(
            num_scalar_prefetch=0,
            grid=(B,),
            in_specs=[pl.BlockSpec((None, N, 3 * D), lambda b: (b, 0, 0))],
            out_specs=pl.BlockSpec((None, N, D), lambda b: (b, 0, 0)),
        ),
        compiler_params=pltpu.CompilerParams(
            dimension_semantics=("parallel",), vmem_limit_bytes=_EW_VMEM_LIMIT
        ),
    )(qkv3d)


# ----------------------------------------------------------------------------- full Block forward
def block_forward(x, p, num_heads):
    B, N, D = x.shape
    assert D % num_heads == 0
    hd = D // num_heads
    scale = float((D / num_heads) ** -0.5)   # matches PyTorch: (dim/num_heads) ** -0.5
    ctr1 = (p["eca1_w"].shape[-1] - 1) // 2  # per-conv center taps (kernel sizes may differ)
    ctr2 = (p["eca2_w"].shape[-1] - 1) // 2
    ctr3 = (p["eca3_w"].shape[-1] - 1) // 2

    # x = eca1(norm1(x))                       (fused into one kernel)
    h = ln_eca(x, p["norm1_w"], p["norm1_b"], p["eca1_w"][:, :, ctr1])
    h2d = h.reshape(B * N, D)

    # x = x + attn(x)                          (dropouts p=0 -> identity; residual fused in proj)
    qkv = linear(h2d, p["qkv_w"], p["qkv_b"])                       # (B*N, 3D)
    att = attention(qkv.reshape(B, N, 3 * D), num_heads, hd, scale)  # (B, N, D) lane-dense
    x1 = linear(att.reshape(B * N, D), p["proj_w"], p["proj_b"], residual=h2d)
    x1 = x1.reshape(B, N, D)

    # x = eca2(x); x = norm2(x)                (fused into one kernel)
    h2 = eca_ln(x1, p["eca2_w"][:, :, ctr2], p["norm2_w"], p["norm2_b"])
    h2_2d = h2.reshape(B * N, D)

    # x = x + mlp(x)                           (GELU fused in fc1, residual fused in fc2)
    m = linear(h2_2d, p["fc1_w"], p["fc1_b"], activation="gelu_tanh")
    x2 = linear(m, p["fc2_w"], p["fc2_b"], residual=h2_2d).reshape(B, N, D)

    # x = eca3(x)
    return eca(x2, p["eca3_w"][:, :, ctr3])


# ----------------------------------------------------------------------------- pure-JAX reference
# Re-baselined at the kernels' precision: bf16 matmul operands, f32 accumulation.
def block_ref(x, p, num_heads):
    B, N, D = x.shape
    H = num_heads
    hd = D // H
    scale = (D / H) ** -0.5
    bf = jnp.bfloat16

    def mm(a, w):  # a @ w.T with bf16 operands, f32 accumulation
        return lax.dot_general(a.astype(bf), w.astype(bf),
                               dimension_numbers=(((1,), (1,)), ((), ())),
                               preferred_element_type=jnp.float32)

    def ln(t, g, b):
        mu = jnp.mean(t, axis=-1, keepdims=True)
        var = jnp.mean((t - mu) ** 2, axis=-1, keepdims=True)
        return (t - mu) / jnp.sqrt(var + 1e-5) * g + b

    def eca_ref(t, w):
        wc = w[:, :, (w.shape[-1] - 1) // 2]
        pooled = jnp.mean(t, axis=1)                  # (B, D)
        gate = jax.nn.sigmoid(mm(pooled, wc))         # (B, D)
        return t * gate[:, None, :]

    def gelu_tanh(t):
        c = 0.7978845608028654
        return 0.5 * t * (1.0 + jnp.tanh(c * (t + 0.044715 * t ** 3)))

    h = eca_ref(ln(x, p["norm1_w"], p["norm1_b"]), p["eca1_w"])
    h2d = h.reshape(B * N, D)
    qkv = mm(h2d, p["qkv_w"]) + p["qkv_b"]
    qkv = qkv.reshape(B, N, 3, H, hd).transpose(2, 0, 3, 1, 4)
    q, k, v = qkv[0], qkv[1], qkv[2]
    s = jnp.einsum("bhnd,bhmd->bhnm", q.astype(bf), k.astype(bf),
                   preferred_element_type=jnp.float32) * scale
    att = jax.nn.softmax(s, axis=-1)
    a = jnp.einsum("bhnm,bhmd->bhnd", att.astype(bf), v.astype(bf),
                   preferred_element_type=jnp.float32)
    a = a.transpose(0, 2, 1, 3).reshape(B * N, D)
    x1 = (h2d + mm(a, p["proj_w"]) + p["proj_b"]).reshape(B, N, D)
    x1 = eca_ref(x1, p["eca2_w"])
    h2 = ln(x1, p["norm2_w"], p["norm2_b"])
    h2_2d = h2.reshape(B * N, D)
    m = gelu_tanh(mm(h2_2d, p["fc1_w"]) + p["fc1_b"])
    m = mm(m, p["fc2_w"]) + p["fc2_b"]
    x2 = (h2_2d + m).reshape(B, N, D)
    return eca_ref(x2, p["eca3_w"])


# ----------------------------------------------------------------------------- main
if __name__ == "__main__":
    B, N, D = 2, 8, 32
    NUM_HEADS = 8
    KSIZE = 5

    key = jax.random.PRNGKey(0)
    ks = jax.random.split(key, 16)

    def rnd(k, shape, s):
        return jax.random.normal(k, shape, dtype=jnp.float32) * s

    params = {
        "norm1_w": 1.0 + rnd(ks[0], (D,), 0.1),
        "norm1_b": rnd(ks[1], (D,), 0.1),
        "eca1_w": rnd(ks[2], (D, D, KSIZE), 0.2),
        "qkv_w": rnd(ks[3], (3 * D, D), 0.08),
        "qkv_b": rnd(ks[4], (3 * D,), 0.05),
        "proj_w": rnd(ks[5], (D, D), 0.08),
        "proj_b": rnd(ks[6], (D,), 0.05),
        "eca2_w": rnd(ks[7], (D, D, KSIZE), 0.2),
        "norm2_w": 1.0 + rnd(ks[8], (D,), 0.1),
        "norm2_b": rnd(ks[9], (D,), 0.1),
        "fc1_w": rnd(ks[10], (2 * D, D), 0.08),
        "fc1_b": rnd(ks[11], (2 * D,), 0.05),
        "fc2_w": rnd(ks[12], (D, 2 * D), 0.08),
        "fc2_b": rnd(ks[13], (D,), 0.05),
        "eca3_w": rnd(ks[14], (D, D, KSIZE), 0.2),
    }
    x = jax.random.normal(ks[15], (B, N, D), dtype=jnp.float32)

    fwd = jax.jit(functools.partial(block_forward, num_heads=NUM_HEADS))
    out = jax.block_until_ready(fwd(x, params))

    ref = block_ref(x, params, NUM_HEADS)

    assert out.shape == (B, N, D)
    # bf16-operand matmuls in both paths; tolerance loosened accordingly (per perf review).
    if not jnp.allclose(out, ref, atol=2e-2, rtol=2e-2):
        max_err = float(jnp.max(jnp.abs(out - ref)))
        raise AssertionError(f"mismatch vs reference, max abs err = {max_err}")

    print("KERNEL_OK")
</pallas_src>

<mosaic_0001>
module attributes {stable_mosaic.version = 11 : i64} {
  func.func @_ln_eca_kernel(%arg0: i32, %arg1: memref<1x8x32xf32, #tpu.memory_space<vmem>>, %arg2: memref<1x32xf32, #tpu.memory_space<vmem>>, %arg3: memref<1x32xf32, #tpu.memory_space<vmem>>, %arg4: memref<32x32xf32, #tpu.memory_space<vmem>>, %arg5: memref<1x8x32xf32, #tpu.memory_space<vmem>>) attributes {dimension_semantics = [#tpu.dimension_semantics<parallel>], iteration_bounds = array<i64: 2>, scalar_prefetch = 0 : i64, scratch_operands = 0 : i64, tpu.core_type = #tpu.core_type<tc>, window_params = [{transform_indices = @transform_0, window_bounds = array<i64: 1, 8, 32>}, {pipeline_mode = #tpu.pipeline_mode<synchronous>, transform_indices = @transform_1, window_bounds = array<i64: 1, 32>}, {pipeline_mode = #tpu.pipeline_mode<synchronous>, transform_indices = @transform_2, window_bounds = array<i64: 1, 32>}, {pipeline_mode = #tpu.pipeline_mode<synchronous>, transform_indices = @transform_3, window_bounds = array<i64: 32, 32>}, {transform_indices = @transform_4, window_bounds = array<i64: 1, 8, 32>}]} {
    %c0 = arith.constant 0 : index
    %c0_0 = arith.constant 0 : index
    %c0_1 = arith.constant 0 : index
    %0 = vector.load %arg1[%c0, %c0_0, %c0_1] : memref<1x8x32xf32, #tpu.memory_space<vmem>>, vector<1x8x32xf32>
    %1 = vector.shape_cast %0 : vector<1x8x32xf32> to vector<8x32xf32>
    %cst = arith.constant dense<0.000000e+00> : vector<8xf32>
    %2 = vector.multi_reduction <add>, %1, %cst [1] : vector<8x32xf32> to vector<8xf32>
    %3 = vector.shape_cast %2 : vector<8xf32> to vector<8x1xf32>
    %cst_2 = arith.constant 3.200000e+01 : f32
    %4 = vector.broadcast %cst_2 : f32 to vector<8x1xf32>
    %5 = arith.divf %3, %4 : vector<8x1xf32>
    %6 = vector.broadcast %5 : vector<8x1xf32> to vector<8x32xf32>
    %7 = arith.subf %1, %6 : vector<8x32xf32>
    %8 = arith.mulf %7, %7 : vector<8x32xf32>
    %cst_3 = arith.constant dense<0.000000e+00> : vector<8xf32>
    %9 = vector.multi_reduction <add>, %8, %cst_3 [1] : vector<8x32xf32> to vector<8xf32>
    %10 = vector.shape_cast %9 : vector<8xf32> to vector<8x1xf32>
    %cst_4 = arith.constant 3.200000e+01 : f32
    %11 = vector.broadcast %cst_4 : f32 to vector<8x1xf32>
    %12 = arith.divf %10, %11 : vector<8x1xf32>
    %cst_5 = arith.constant 9.99999974E-6 : f32
    %13 = vector.broadcast %cst_5 : f32 to vector<8x1xf32>
    %14 = arith.addf %12, %13 : vector<8x1xf32>
    %15 = math.rsqrt %14 : vector<8x1xf32>
    %16 = vector.broadcast %15 : vector<8x1xf32> to vector<8x32xf32>
    %17 = arith.mulf %7, %16 : vector<8x32xf32>
    %c0_6 = arith.constant 0 : index
    %c0_7 = arith.constant 0 : index
    %18 = vector.load %arg2[%c0_6, %c0_7] : memref<1x32xf32, #tpu.memory_space<vmem>>, vector<1x32xf32>
    %19 = vector.broadcast %18 : vector<1x32xf32> to vector<8x32xf32>
    %20 = arith.mulf %17, %19 : vector<8x32xf32>
    %c0_8 = arith.constant 0 : index
    %c0_9 = arith.constant 0 : index
    %21 = vector.load %arg3[%c0_8, %c0_9] : memref<1x32xf32, #tpu.memory_space<vmem>>, vector<1x32xf32>
    %22 = vector.broadcast %21 : vector<1x32xf32> to vector<8x32xf32>
    %23 = arith.addf %20, %22 : vector<8x32xf32>
    %cst_10 = arith.constant dense<0.000000e+00> : vector<32xf32>
    %24 = vector.multi_reduction <add>, %23, %cst_10 [0] : vector<8x32xf32> to vector<32xf32>
    %25 = vector.shape_cast %24 : vector<32xf32> to vector<1x32xf32>
    %cst_11 = arith.constant 8.000000e+00 : f32
    %26 = vector.broadcast %cst_11 : f32 to vector<1x32xf32>
    %27 = arith.divf %25, %26 : vector<1x32xf32>
    %28 = arith.truncf %27 : vector<1x32xf32> to vector<1x32xbf16>
    %c0_12 = arith.constant 0 : index
    %c0_13 = arith.constant 0 : index
    %29 = vector.load %arg4[%c0_12, %c0_13] : memref<32x32xf32, #tpu.memory_space<vmem>>, vector<32x32xf32>
    %30 = arith.truncf %29 : vector<32x32xf32> to vector<32x32xbf16>
    %cst_14 = arith.constant dense<0.000000e+00> : vector<1x32xf32>
    %31 = tpu.matmul %28, %30, %cst_14 {dimension_numbers = #tpu.dot_dimension_numbers<[1], [1], [0], [0], [0, 0, 1, 0], [], []>} : vector<1x32xbf16>, vector<32x32xbf16>, vector<1x32xf32> -> vector<1x32xf32>
    %32 = arith.negf %31 : vector<1x32xf32>
    %33 = math.exp %32 : vector<1x32xf32>
    %cst_15 = arith.constant 1.000000e+00 : f32
    %34 = vector.broadcast %cst_15 : f32 to vector<1x32xf32>
    %35 = arith.addf %34, %33 : vector<1x32xf32>
    %36 = arith.divf %34, %35 : vector<1x32xf32>
    %37 = vector.broadcast %36 : vector<1x32xf32> to vector<8x32xf32>
    %38 = arith.mulf %23, %37 : vector<8x32xf32>
    %c0_16 = arith.constant 0 : index
    %c0_17 = arith.constant 0 : index
    %c0_18 = arith.constant 0 : index
    %39 = vector.load %arg5[%c0_16, %c0_17, %c0_18] : memref<1x8x32xf32, #tpu.memory_space<vmem>>, vector<1x8x32xf32>
    %40 = vector.shape_cast %39 : vector<1x8x32xf32> to vector<8x32xf32>
    %41 = vector.shape_cast %38 : vector<8x32xf32> to vector<1x8x32xf32>
    tpu.vector_store %arg5[%c0_16, %c0_17, %c0_18], %41 {strides = array<i32>} : memref<1x8x32xf32, #tpu.memory_space<vmem>>, vector<1x8x32xf32>,
    return
  }
  func.func @transform_0(%arg0: i32) -> (i32, i32, i32) {
    %c0_i32 = arith.constant 0 : i32
    %c0_i32_0 = arith.constant 0 : i32
    %c0_i32_1 = arith.constant 0 : i32
    return %arg0, %c0_i32, %c0_i32_0 : i32, i32, i32
  }
  func.func @transform_1(%arg0: i32) -> (i32, i32) {
    %c0_i32 = arith.constant 0 : i32
    %c0_i32_0 = arith.constant 0 : i32
    %c0_i32_1 = arith.constant 0 : i32
    return %c0_i32, %c0_i32_0 : i32, i32
  }
  func.func @transform_2(%arg0: i32) -> (i32, i32) {
    %c0_i32 = arith.constant 0 : i32
    %c0_i32_0 = arith.constant 0 : i32
    %c0_i32_1 = arith.constant 0 : i32
    return %c0_i32, %c0_i32_0 : i32, i32
  }
  func.func @transform_3(%arg0: i32) -> (i32, i32) {
    %c0_i32 = arith.constant 0 : i32
    %c0_i32_0 = arith.constant 0 : i32
    %c0_i32_1 = arith.constant 0 : i32
    return %c0_i32, %c0_i32_0 : i32, i32
  }
  func.func @transform_4(%arg0: i32) -> (i32, i32, i32) {
    %c0_i32 = arith.constant 0 : i32
    %c0_i32_0 = arith.constant 0 : i32
    %c0_i32_1 = arith.constant 0 : i32
    return %arg0, %c0_i32, %c0_i32_0 : i32, i32, i32
  }
}

module attributes {stable_mosaic.version = 11 : i64} {
  func.func @_matmul_bias_kernel(%arg0: i32, %arg1: i32, %arg2: memref<16x32xf32, #tpu.memory_space<vmem>>, %arg3: memref<96x32xf32, #tpu.memory_space<vmem>>, %arg4: memref<1x96xf32, #tpu.memory_space<vmem>>, %arg5: memref<16x96xf32, #tpu.memory_space<vmem>>) attributes {dimension_semantics = [#tpu.dimension_semantics<parallel>, #tpu.dimension_semantics<parallel>], iteration_bounds = array<i64: 1, 1>, scalar_prefetch = 0 : i64, scratch_operands = 0 : i64, tpu.core_type = #tpu.core_type<tc>, window_params = [{transform_indices = @transform_0, window_bounds = array<i64: 16, 32>}, {transform_indices = @transform_1, window_bounds = array<i64: 96, 32>}, {transform_indices = @transform_2, window_bounds = array<i64: 1, 96>}, {transform_indices = @transform_3, window_bounds = array<i64: 16, 96>}]} {
    %c0 = arith.constant 0 : index
    %c0_0 = arith.constant 0 : index
    %0 = vector.load %arg2[%c0, %c0_0] : memref<16x32xf32, #tpu.memory_space<vmem>>, vector<16x32xf32>
    %1 = arith.truncf %0 : vector<16x32xf32> to vector<16x32xbf16>
    %c0_1 = arith.constant 0 : index
    %c0_2 = arith.constant 0 : index
    %2 = vector.load %arg3[%c0_1, %c0_2] : memref<96x32xf32, #tpu.memory_space<vmem>>, vector<96x32xf32>
    %3 = arith.truncf %2 : vector<96x32xf32> to vector<96x32xbf16>
    %cst = arith.constant dense<0.000000e+00> : vector<16x96xf32>
    %4 = tpu.matmul %1, %3, %cst {dimension_numbers = #tpu.dot_dimension_numbers<[1], [1], [0], [0], [0, 0, 1, 0], [], []>} : vector<16x32xbf16>, vector<96x32xbf16>, vector<16x96xf32> -> vector<16x96xf32>
    %c0_3 = arith.constant 0 : index
    %c0_4 = arith.constant 0 : index
    %5 = vector.load %arg4[%c0_3, %c0_4] : memref<1x96xf32, #tpu.memory_space<vmem>>, vector<1x96xf32>
    %6 = vector.broadcast %5 : vector<1x96xf32> to vector<16x96xf32>
    %7 = arith.addf %4, %6 : vector<16x96xf32>
    %c0_5 = arith.constant 0 : index
    %c0_6 = arith.constant 0 : index
    %8 = vector.load %arg5[%c0_5, %c0_6] : memref<16x96xf32, #tpu.memory_space<vmem>>, vector<16x96xf32>
    tpu.vector_store %arg5[%c0_5, %c0_6], %7 {strides = array<i32>} : memref<16x96xf32, #tpu.memory_space<vmem>>, vector<16x96xf32>,
    return
  }
  func.func @transform_0(%arg0: i32, %arg1: i32) -> (i32, i32) {
    %c0_i32 = arith.constant 0 : i32
    %c0_i32_0 = arith.constant 0 : i32
    return %arg0, %c0_i32 : i32, i32
  }
  func.func @transform_1(%arg0: i32, %arg1: i32) -> (i32, i32) {
    %c0_i32 = arith.constant 0 : i32
    %c0_i32_0 = arith.constant 0 : i32
    return %arg1, %c0_i32 : i32, i32
  }
  func.func @transform_2(%arg0: i32, %arg1: i32) -> (i32, i32) {
    %c0_i32 = arith.constant 0 : i32
    %c0_i32_0 = arith.constant 0 : i32
    return %c0_i32, %arg1 : i32, i32
  }
  func.func @transform_3(%arg0: i32, %arg1: i32) -> (i32, i32) {
    %c0_i32 = arith.constant 0 : i32
    return %arg0, %arg1 : i32, i32
  }
}

module attributes {stable_mosaic.version = 11 : i64} {
  func.func @_matmul_bias_kernel(%arg0: i32, %arg1: i32, %arg2: memref<16x32xf32, #tpu.memory_space<vmem>>, %arg3: memref<32x32xf32, #tpu.memory_space<vmem>>, %arg4: memref<1x32xf32, #tpu.memory_space<vmem>>, %arg5: memref<16x32xf32, #tpu.memory_space<vmem>>, %arg6: memref<16x32xf32, #tpu.memory_space<vmem>>) attributes {dimension_semantics = [#tpu.dimension_semantics<parallel>, #tpu.dimension_semantics<parallel>], iteration_bounds = array<i64: 1, 1>, scalar_prefetch = 0 : i64, scratch_operands = 0 : i64, tpu.core_type = #tpu.core_type<tc>, window_params = [{transform_indices = @transform_0, window_bounds = array<i64: 16, 32>}, {transform_indices = @transform_1, window_bounds = array<i64: 32, 32>}, {transform_indices = @transform_2, window_bounds = array<i64: 1, 32>}, {transform_indices = @transform_3, window_bounds = array<i64: 16, 32>}, {transform_indices = @transform_4, window_bounds = array<i64: 16, 32>}]} {
    %c0 = arith.constant 0 : index
    %c0_0 = arith.constant 0 : index
    %0 = vector.load %arg2[%c0, %c0_0] : memref<16x32xf32, #tpu.memory_space<vmem>>, vector<16x32xf32>
    %1 = arith.truncf %0 : vector<16x32xf32> to vector<16x32xbf16>
    %c0_1 = arith.constant 0 : index
    %c0_2 = arith.constant 0 : index
    %2 = vector.load %arg3[%c0_1, %c0_2] : memref<32x32xf32, #tpu.memory_space<vmem>>, vector<32x32xf32>
    %3 = arith.truncf %2 : vector<32x32xf32> to vector<32x32xbf16>
    %cst = arith.constant dense<0.000000e+00> : vector<16x32xf32>
    %4 = tpu.matmul %1, %3, %cst {dimension_numbers = #tpu.dot_dimension_numbers<[1], [1], [0], [0], [0, 0, 1, 0], [], []>} : vector<16x32xbf16>, vector<32x32xbf16>, vector<16x32xf32> -> vector<16x32xf32>
    %c0_3 = arith.constant 0 : index
    %c0_4 = arith.constant 0 : index
    %5 = vector.load %arg4[%c0_3, %c0_4] : memref<1x32xf32, #tpu.memory_space<vmem>>, vector<1x32xf32>
    %6 = vector.broadcast %5 : vector<1x32xf32> to vector<16x32xf32>
    %7 = arith.addf %4, %6 : vector<16x32xf32>
    %c0_5 = arith.constant 0 : index
    %c0_6 = arith.constant 0 : index
    %8 = vector.load %arg5[%c0_5, %c0_6] : memref<16x32xf32, #tpu.memory_space<vmem>>, vector<16x32xf32>
    %9 = arith.addf %7, %8 : vector<16x32xf32>
    %c0_7 = arith.constant 0 : index
    %c0_8 = arith.constant 0 : index
    %10 = vector.load %arg6[%c0_7, %c0_8] : memref<16x32xf32, #tpu.memory_space<vmem>>, vector<16x32xf32>
    tpu.vector_store %arg6[%c0_7, %c0_8], %9 {strides = array<i32>} : memref<16x32xf32, #tpu.memory_space<vmem>>, vector<16x32xf32>,
    return
  }
  func.func @transform_0(%arg0: i32, %arg1: i32) -> (i32, i32) {
    %c0_i32 = arith.constant 0 : i32
    %c0_i32_0 = arith.constant 0 : i32
    return %arg0, %c0_i32 : i32, i32
  }
  func.func @transform_1(%arg0: i32, %arg1: i32) -> (i32, i32) {
    %c0_i32 = arith.constant 0 : i32
    %c0_i32_0 = arith.constant 0 : i32
    return %arg1, %c0_i32 : i32, i32
  }
  func.func @transform_2(%arg0: i32, %arg1: i32) -> (i32, i32) {
    %c0_i32 = arith.constant 0 : i32
    %c0_i32_0 = arith.constant 0 : i32
    return %c0_i32, %arg1 : i32, i32
  }
  func.func @transform_3(%arg0: i32, %arg1: i32) -> (i32, i32) {
    %c0_i32 = arith.constant 0 : i32
    return %arg0, %arg1 : i32, i32
  }
  func.func @transform_4(%arg0: i32, %arg1: i32) -> (i32, i32) {
    %c0_i32 = arith.constant 0 : i32
    return %arg0, %arg1 : i32, i32
  }
}

module attributes {stable_mosaic.version = 11 : i64} {
  func.func @_attention_kernel(%arg0: i32, %arg1: memref<1x8x96xf32, #tpu.memory_space<vmem>>, %arg2: memref<1x8x32xf32, #tpu.memory_space<vmem>>) attributes {dimension_semantics = [#tpu.dimension_semantics<parallel>], iteration_bounds = array<i64: 2>, scalar_prefetch = 0 : i64, scratch_operands = 0 : i64, tpu.core_type = #tpu.core_type<tc>, window_params = [{transform_indices = @transform_0, window_bounds = array<i64: 1, 8, 96>}, {transform_indices = @transform_1, window_bounds = array<i64: 1, 8, 32>}]} {
    %c0 = arith.constant 0 : index
    %c0_0 = arith.constant 0 : index
    %c0_1 = arith.constant 0 : index
    %0 = vector.load %arg1[%c0, %c0_0, %c0_1] : memref<1x8x96xf32, #tpu.memory_space<vmem>>, vector<1x8x96xf32>
    %1 = vector.shape_cast %0 : vector<1x8x96xf32> to vector<8x96xf32>
    %2 = vector.extract_strided_slice %1 {offsets = [0, 0], sizes = [8, 4], strides = [1, 1]} : vector<8x96xf32> to vector<8x4xf32>
    %3 = arith.truncf %2 : vector<8x4xf32> to vector<8x4xbf16>
    %4 = vector.extract_strided_slice %1 {offsets = [0, 32], sizes = [8, 4], strides = [1, 1]} : vector<8x96xf32> to vector<8x4xf32>
    %5 = arith.truncf %4 : vector<8x4xf32> to vector<8x4xbf16>
    %6 = vector.extract_strided_slice %1 {offsets = [0, 64], sizes = [8, 4], strides = [1, 1]} : vector<8x96xf32> to vector<8x4xf32>
    %7 = arith.truncf %6 : vector<8x4xf32> to vector<8x4xbf16>
    %cst = arith.constant dense<0.000000e+00> : vector<8x8xf32>
    %8 = tpu.matmul %3, %5, %cst {dimension_numbers = #tpu.dot_dimension_numbers<[1], [1], [0], [0], [0, 0, 1, 0], [], []>} : vector<8x4xbf16>, vector<8x4xbf16>, vector<8x8xf32> -> vector<8x8xf32>
    %cst_2 = arith.constant 5.000000e-01 : f32
    %9 = vector.broadcast %cst_2 : f32 to vector<8x8xf32>
    %10 = arith.mulf %8, %9 : vector<8x8xf32>
    %cst_3 = arith.constant dense<0xFF800000> : vector<8xf32>
    %11 = vector.multi_reduction <maximumf>, %10, %cst_3 [1] : vector<8x8xf32> to vector<8xf32>
    %12 = vector.shape_cast %11 : vector<8xf32> to vector<8x1xf32>
    %13 = vector.broadcast %12 : vector<8x1xf32> to vector<8x8xf32>
    %14 = arith.subf %10, %13 : vector<8x8xf32>
    %15 = math.exp %14 : vector<8x8xf32>
    %cst_4 = arith.constant dense<0.000000e+00> : vector<8xf32>
    %16 = vector.multi_reduction <add>, %15, %cst_4 [1] : vector<8x8xf32> to vector<8xf32>
    %17 = vector.shape_cast %16 : vector<8xf32> to vector<8x1xf32>
    %18 = arith.truncf %15 : vector<8x8xf32> to vector<8x8xbf16>
    %cst_5 = arith.constant dense<0.000000e+00> : vector<8x4xf32>
    %19 = tpu.matmul %18, %7, %cst_5 {dimension_numbers = #tpu.dot_dimension_numbers<[1], [0], [0], [1], [0, 0, 1, 1], [], []>} : vector<8x8xbf16>, vector<8x4xbf16>, vector<8x4xf32> -> vector<8x4xf32>
    %20 = tpu.reciprocal %17 {approx = true} : vector<8x1xf32> -> vector<8x1xf32>
    %21 = vector.broadcast %20 : vector<8x1xf32> to vector<8x4xf32>
    %22 = arith.mulf %19, %21 : vector<8x4xf32>
    %c0_6 = arith.constant 0 : index
    %c0_7 = arith.constant 0 : index
    %c0_8 = arith.constant 0 : index
    %23 = vector.load %arg2[%c0_6, %c0_7, %c0_8] : memref<1x8x32xf32, #tpu.memory_space<vmem>>, vector<1x8x4xf32>
    %24 = vector.shape_cast %23 : vector<1x8x4xf32> to vector<8x4xf32>
    %25 = vector.shape_cast %22 : vector<8x4xf32> to vector<1x8x4xf32>
    tpu.vector_store %arg2[%c0_6, %c0_7, %c0_8], %25 {strides = array<i32>} : memref<1x8x32xf32, #tpu.memory_space<vmem>>, vector<1x8x4xf32>,
    %26 = vector.extract_strided_slice %1 {offsets = [0, 4], sizes = [8, 4], strides = [1, 1]} : vector<8x96xf32> to vector<8x4xf32>
    %27 = arith.truncf %26 : vector<8x4xf32> to vector<8x4xbf16>
    %28 = vector.extract_strided_slice %1 {offsets = [0, 36], sizes = [8, 4], strides = [1, 1]} : vector<8x96xf32> to vector<8x4xf32>
    %29 = arith.truncf %28 : vector<8x4xf32> to vector<8x4xbf16>
    %30 = vector.extract_strided_slice %1 {offsets = [0, 68], sizes = [8, 4], strides = [1, 1]} : vector<8x96xf32> to vector<8x4xf32>
    %31 = arith.truncf %30 : vector<8x4xf32> to vector<8x4xbf16>
    %cst_9 = arith.constant dense<0.000000e+00> : vector<8x8xf32>
    %32 = tpu.matmul %27, %29, %cst_9 {dimension_numbers = #tpu.dot_dimension_numbers<[1], [1], [0], [0], [0, 0, 1, 0], [], []>} : vector<8x4xbf16>, vector<8x4xbf16>, vector<8x8xf32> -> vector<8x8xf32>
    %cst_10 = arith.constant 5.000000e-01 : f32
    %33 = vector.broadcast %cst_10 : f32 to vector<8x8xf32>
    %34 = arith.mulf %32, %33 : vector<8x8xf32>
    %cst_11 = arith.constant dense<0xFF800000> : vector<8xf32>
    %35 = vector.multi_reduction <maximumf>, %34, %cst_11 [1] : vector<8x8xf32> to vector<8xf32>
    %36 = vector.shape_cast %35 : vector<8xf32> to vector<8x1xf32>
    %37 = vector.broadcast %36 : vector<8x1xf32> to vector<8x8xf32>
    %38 = arith.subf %34, %37 : vector<8x8xf32>
    %39 = math.exp %38 : vector<8x8xf32>
    %cst_12 = arith.constant dense<0.000000e+00> : vector<8xf32>
    %40 = vector.multi_reduction <add>, %39, %cst_12 [1] : vector<8x8xf32> to vector<8xf32>
    %41 = vector.shape_cast %40 : vector<8xf32> to vector<8x1xf32>
    %42 = arith.truncf %39 : vector<8x8xf32> to vector<8x8xbf16>
    %cst_13 = arith.constant dense<0.000000e+00> : vector<8x4xf32>
    %43 = tpu.matmul %42, %31, %cst_13 {dimension_numbers = #tpu.dot_dimension_numbers<[1], [0], [0], [1], [0, 0, 1, 1], [], []>} : vector<8x8xbf16>, vector<8x4xbf16>, vector<8x4xf32> -> vector<8x4xf32>
    %44 = tpu.reciprocal %41 {approx = true} : vector<8x1xf32> -> vector<8x1xf32>
    %45 = vector.broadcast %44 : vector<8x1xf32> to vector<8x4xf32>
    %46 = arith.mulf %43, %45 : vector<8x4xf32>
    %c0_14 = arith.constant 0 : index
    %c0_15 = arith.constant 0 : index
    %c4 = arith.constant 4 : index
    %47 = vector.load %arg2[%c0_14, %c0_15, %c4] : memref<1x8x32xf32, #tpu.memory_space<vmem>>, vector<1x8x4xf32>
    %48 = vector.shape_cast %47 : vector<1x8x4xf32> to vector<8x4xf32>
    %49 = vector.shape_cast %46 : vector<8x4xf32> to vector<1x8x4xf32>
    tpu.vector_store %arg2[%c0_14, %c0_15, %c4], %49 {strides = array<i32>} : memref<1x8x32xf32, #tpu.memory_space<vmem>>, vector<1x8x4xf32>,
    %50 = vector.extract_strided_slice %1 {offsets = [0, 8], sizes = [8, 4], strides = [1, 1]} : vector<8x96xf32> to vector<8x4xf32>
    %51 = arith.truncf %50 : vector<8x4xf32> to vector<8x4xbf16>
    %52 = vector.extract_strided_slice %1 {offsets = [0, 40], sizes = [8, 4], strides = [1, 1]} : vector<8x96xf32> to vector<8x4xf32>
    %53 = arith.truncf %52 : vector<8x4xf32> to vector<8x4xbf16>
    %54 = vector.extract_strided_slice %1 {offsets = [0, 72], sizes = [8, 4], strides = [1, 1]} : vector<8x96xf32> to vector<8x4xf32>
    %55 = arith.truncf %54 : vector<8x4xf32> to vector<8x4xbf16>
    %cst_16 = arith.constant dense<0.000000e+00> : vector<8x8xf32>
    %56 = tpu.matmul %51, %53, %cst_16 {dimension_numbers = #tpu.dot_dimension_numbers<[1], [1], [0], [0], [0, 0, 1, 0], [], []>} : vector<8x4xbf16>, vector<8x4xbf16>, vector<8x8xf32> -> vector<8x8xf32>
    %cst_17 = arith.constant 5.000000e-01 : f32
    %57 = vector.broadcast %cst_17 : f32 to vector<8x8xf32>
    %58 = arith.mulf %56, %57 : vector<8x8xf32>
    %cst_18 = arith.constant dense<0xFF800000> : vector<8xf32>
    %59 = vector.multi_reduction <maximumf>, %58, %cst_18 [1] : vector<8x8xf32> to vector<8xf32>
    %60 = vector.shape_cast %59 : vector<8xf32> to vector<8x1xf32>
    %61 = vector.broadcast %60 : vector<8x1xf32> to vector<8x8xf32>
    %62 = arith.subf %58, %61 : vector<8x8xf32>
    %63 = math.exp %62 : vector<8x8xf32>
    %cst_19 = arith.constant dense<0.000000e+00> : vector<8xf32>
    %64 = vector.multi_reduction <add>, %63, %cst_19 [1] : vector<8x8xf32> to vector<8xf32>
    %65 = vector.shape_cast %64 : vector<8xf32> to vector<8x1xf32>
    %66 = arith.truncf %63 : vector<8x8xf32> to vector<8x8xbf16>
    %cst_20 = arith.constant dense<0.000000e+00> : vector<8x4xf32>
    %67 = tpu.matmul %66, %55, %cst_20 {dimension_numbers = #tpu.dot_dimension_numbers<[1], [0], [0], [1], [0, 0, 1, 1], [], []>} : vector<8x8xbf16>, vector<8x4xbf16>, vector<8x4xf32> -> vector<8x4xf32>
    %68 = tpu.reciprocal %65 {approx = true} : vector<8x1xf32> -> vector<8x1xf32>
    %69 = vector.broadcast %68 : vector<8x1xf32> to vector<8x4xf32>
    %70 = arith.mulf %67, %69 : vector<8x4xf32>
    %c0_21 = arith.constant 0 : index
    %c0_22 = arith.constant 0 : index
    %c8 = arith.constant 8 : index
    %71 = vector.load %arg2[%c0_21, %c0_22, %c8] : memref<1x8x32xf32, #tpu.memory_space<vmem>>, vector<1x8x4xf32>
    %72 = vector.shape_cast %71 : vector<1x8x4xf32> to vector<8x4xf32>
    %73 = vector.shape_cast %70 : vector<8x4xf32> to vector<1x8x4xf32>
    tpu.vector_store %arg2[%c0_21, %c0_22, %c8], %73 {strides = array<i32>} : memref<1x8x32xf32, #tpu.memory_space<vmem>>, vector<1x8x4xf32>,
    %74 = vector.extract_strided_slice %1 {offsets = [0, 12], sizes = [8, 4], strides = [1, 1]} : vector<8x96xf32> to vector<8x4xf32>
    %75 = arith.truncf %74 : vector<8x4xf32> to vector<8x4xbf16>
    %76 = vector.extract_strided_slice %1 {offsets = [0, 44], sizes = [8, 4], strides = [1, 1]} : vector<8x96xf32> to vector<8x4xf32>
    %77 = arith.truncf %76 : vector<8x4xf32> to vector<8x4xbf16>
    %78 = vector.extract_strided_slice %1 {offsets = [0, 76], sizes = [8, 4], strides = [1, 1]} : vector<8x96xf32> to vector<8x4xf32>
    %79 = arith.truncf %78 : vector<8x4xf32> to vector<8x4xbf16>
    %cst_23 = arith.constant dense<0.000000e+00> : vector<8x8xf32>
    %80 = tpu.matmul %75, %77, %cst_23 {dimension_numbers = #tpu.dot_dimension_numbers<[1], [1], [0], [0], [0, 0, 1, 0], [], []>} : vector<8x4xbf16>, vector<8x4xbf16>, vector<8x8xf32> -> vector<8x8xf32>
    %cst_24 = arith.constant 5.000000e-01 : f32
    %81 = vector.broadcast %cst_24 : f32 to vector<8x8xf32>
    %82 = arith.mulf %80, %81 : vector<8x8xf32>
    %cst_25 = arith.constant dense<0xFF800000> : vector<8xf32>
    %83 = vector.multi_reduction <maximumf>, %82, %cst_25 [1] : vector<8x8xf32> to vector<8xf32>
    %84 = vector.shape_cast %83 : vector<8xf32> to vector<8x1xf32>
    %85 = vector.broadcast %84 : vector<8x1xf32> to vector<8x8xf32>
    %86 = arith.subf %82, %85 : vector<8x8xf32>
    %87 = math.exp %86 : vector<8x8xf32>
    %cst_26 = arith.constant dense<0.000000e+00> : vector<8xf32>
    %88 = vector.multi_reduction <add>, %87, %cst_26 [1] : vector<8x8xf32> to vector<8xf32>
    %89 = vector.shape_cast %88 : vector<8xf32> to vector<8x1xf32>
    %90 = arith.truncf %87 : vector<8x8xf32> to vector<8x8xbf16>
    %cst_27 = arith.constant dense<0.000000e+00> : vector<8x4xf32>
    %91 = tpu.matmul %90, %79, %cst_27 {dimension_numbers = #tpu.dot_dimension_numbers<[1], [0], [0], [1], [0, 0, 1, 1], [], []>} : vector<8x8xbf16>, vector<8x4xbf16>, vector<8x4xf32> -> vector<8x4xf32>
    %92 = tpu.reciprocal %89 {approx = true} : vector<8x1xf32> -> vector<8x1xf32>
    %93 = vector.broadcast %92 : vector<8x1xf32> to vector<8x4xf32>
    %94 = arith.mulf %91, %93 : vector<8x4xf32>
    %c0_28 = arith.constant 0 : index
    %c0_29 = arith.constant 0 : index
    %c12 = arith.constant 12 : index
    %95 = vector.load %arg2[%c0_28, %c0_29, %c12] : memref<1x8x32xf32, #tpu.memory_space<vmem>>, vector<1x8x4xf32>
    %96 = vector.shape_cast %95 : vector<1x8x4xf32> to vector<8x4xf32>
    %97 = vector.shape_cast %94 : vector<8x4xf32> to vector<1x8x4xf32>
    tpu.vector_store %arg2[%c0_28, %c0_29, %c12], %97 {strides = array<i32>} : memref<1x8x32xf32, #tpu.memory_space<vmem>>, vector<1x8x4xf32>,
    %98 = vector.extract_strided_slice %1 {offsets = [0, 16], sizes = [8, 4], strides = [1, 1]} : vector<8x96xf32> to vector<8x4xf32>
    %99 = arith.truncf %98 : vector<8x4xf32> to vector<8x4xbf16>
    %100 = vector.extract_strided_slice %1 {offsets = [0, 48], sizes = [8, 4], strides = [1, 1]} : vector<8x96xf32> to vector<8x4xf32>
    %101 = arith.truncf %100 : vector<8x4xf32> to vector<8x4xbf16>
    %102 = vector.extract_strided_slice %1 {offsets = [0, 80], sizes = [8, 4], strides = [1, 1]} : vector<8x96xf32> to vector<8x4xf32>
    %103 = arith.truncf %102 : vector<8x4xf32> to vector<8x4xbf16>
    %cst_30 = arith.constant dense<0.000000e+00> : vector<8x8xf32>
    %104 = tpu.matmul %99, %101, %cst_30 {dimension_numbers = #tpu.dot_dimension_numbers<[1], [1], [0], [0], [0, 0, 1, 0], [], []>} : vector<8x4xbf16>, vector<8x4xbf16>, vector<8x8xf32> -> vector<8x8xf32>
    %cst_31 = arith.constant 5.000000e-01 : f32
    %105 = vector.broadcast %cst_31 : f32 to vector<8x8xf32>
    %106 = arith.mulf %104, %105 : vector<8x8xf32>
    %cst_32 = arith.constant dense<0xFF800000> : vector<8xf32>
    %107 = vector.multi_reduction <maximumf>, %106, %cst_32 [1] : vector<8x8xf32> to vector<8xf32>
    %108 = vector.shape_cast %107 : vector<8xf32> to vector<8x1xf32>
    %109 = vector.broadcast %108 : vector<8x1xf32> to vector<8x8xf32>
    %110 = arith.subf %106, %109 : vector<8x8xf32>
    %111 = math.exp %110 : vector<8x8xf32>
    %cst_33 = arith.constant dense<0.000000e+00> : vector<8xf32>
    %112 = vector.multi_reduction <add>, %111, %cst_33 [1] : vector<8x8xf32> to vector<8xf32>
    %113 = vector.shape_cast %112 : vector<8xf32> to vector<8x1xf32>
    %114 = arith.truncf %111 : vector<8x8xf32> to vector<8x8xbf16>
    %cst_34 = arith.constant dense<0.000000e+00> : vector<8x4xf32>
    %115 = tpu.matmul %114, %103, %cst_34 {dimension_numbers = #tpu.dot_dimension_numbers<[1], [0], [0], [1], [0, 0, 1, 1], [], []>} : vector<8x8xbf16>, vector<8x4xbf16>, vector<8x4xf32> -> vector<8x4xf32>
    %116 = tpu.reciprocal %113 {approx = true} : vector<8x1xf32> -> vector<8x1xf32>
    %117 = vector.broadcast %116 : vector<8x1xf32> to vector<8x4xf32>
    %118 = arith.mulf %115, %117 : vector<8x4xf32>
    %c0_35 = arith.constant 0 : index
    %c0_36 = arith.constant 0 : index
    %c16 = arith.constant 16 : index
    %119 = vector.load %arg2[%c0_35, %c0_36, %c16] : memref<1x8x32xf32, #tpu.memory_space<vmem>>, vector<1x8x4xf32>
    %120 = vector.shape_cast %119 : vector<1x8x4xf32> to vector<8x4xf32>
    %121 = vector.shape_cast %118 : vector<8x4xf32> to vector<1x8x4xf32>
    tpu.vector_store %arg2[%c0_35, %c0_36, %c16], %121 {strides = array<i32>} : memref<1x8x32xf32, #tpu.memory_space<vmem>>, vector<1x8x4xf32>,
    %122 = vector.extract_strided_slice %1 {offsets = [0, 20], sizes = [8, 4], strides = [1, 1]} : vector<8x96xf32> to vector<8x4xf32>
    %123 = arith.truncf %122 : vector<8x4xf32> to vector<8x4xbf16>
    %124 = vector.extract_strided_slice %1 {offsets = [0, 52], sizes = [8, 4], strides = [1, 1]} : vector<8x96xf32> to vector<8x4xf32>
    %125 = arith.truncf %124 : vector<8x4xf32> to vector<8x4xbf16>
    %126 = vector.extract_strided_slice %1 {offsets = [0, 84], sizes = [8, 4], strides = [1, 1]} : vector<8x96xf32> to vector<8x4xf32>
    %127 = arith.truncf %126 : vector<8x4xf32> to vector<8x4xbf16>
    %cst_37 = arith.constant dense<0.000000e+00> : vector<8x8xf32>
    %128 = tpu.matmul %123, %125, %cst_37 {dimension_numbers = #tpu.dot_dimension_numbers<[1], [1], [0], [0], [0, 0, 1, 0], [], []>} : vector<8x4xbf16>, vector<8x4xbf16>, vector<8x8xf32> -> vector<8x8xf32>
    %cst_38 = arith.constant 5.000000e-01 : f32
    %129 = vector.broadcast %cst_38 : f32 to vector<8x8xf32>
    %130 = arith.mulf %128, %129 : vector<8x8xf32>
    %cst_39 = arith.constant dense<0xFF800000> : vector<8xf32>
    %131 = vector.multi_reduction <maximumf>, %130, %cst_39 [1] : vector<8x8xf32> to vector<8xf32>
    %132 = vector.shape_cast %131 : vector<8xf32> to vector<8x1xf32>
    %133 = vector.broadcast %132 : vector<8x1xf32> to vector<8x8xf32>
    %134 = arith.subf %130, %133 : vector<8x8xf32>
    %135 = math.exp %134 : vector<8x8xf32>
    %cst_40 = arith.constant dense<0.000000e+00> : vector<8xf32>
    %136 = vector.multi_reduction <add>, %135, %cst_40 [1] : vector<8x8xf32> to vector<8xf32>
    %137 = vector.shape_cast %136 : vector<8xf32> to vector<8x1xf32>
    %138 = arith.truncf %135 : vector<8x8xf32> to vector<8x8xbf16>
    %cst_41 = arith.constant dense<0.000000e+00> : vector<8x4xf32>
    %139 = tpu.matmul %138, %127, %cst_41 {dimension_numbers = #tpu.dot_dimension_numbers<[1], [0], [0], [1], [0, 0, 1, 1], [], []>} : vector<8x8xbf16>, vector<8x4xbf16>, vector<8x4xf32> -> vector<8x4xf32>
    %140 = tpu.reciprocal %137 {approx = true} : vector<8x1xf32> -> vector<8x1xf32>
    %141 = vector.broadcast %140 : vector<8x1xf32> to vector<8x4xf32>
    %142 = arith.mulf %139, %141 : vector<8x4xf32>
    %c0_42 = arith.constant 0 : index
    %c0_43 = arith.constant 0 : index
    %c20 = arith.constant 20 : index
    %143 = vector.load %arg2[%c0_42, %c0_43, %c20] : memref<1x8x32xf32, #tpu.memory_space<vmem>>, vector<1x8x4xf32>
    %144 = vector.shape_cast %143 : vector<1x8x4xf32> to vector<8x4xf32>
    %145 = vector.shape_cast %142 : vector<8x4xf32> to vector<1x8x4xf32>
    tpu.vector_store %arg2[%c0_42, %c0_43, %c20], %145 {strides = array<i32>} : memref<1x8x32xf32, #tpu.memory_space<vmem>>, vector<1x8x4xf32>,
    %146 = vector.extract_strided_slice %1 {offsets = [0, 24], sizes = [8, 4], strides = [1, 1]} : vector<8x96xf32> to vector<8x4xf32>
    %147 = arith.truncf %146 : vector<8x4xf32> to vector<8x4xbf16>
    %148 = vector.extract_strided_slice %1 {offsets = [0, 56], sizes = [8, 4], strides = [1, 1]} : vector<8x96xf32> to vector<8x4xf32>
    %149 = arith.truncf %148 : vector<8x4xf32> to vector<8x4xbf16>
    %150 = vector.extract_strided_slice %1 {offsets = [0, 88], sizes = [8, 4], strides = [1, 1]} : vector<8x96xf32> to vector<8x4xf32>
    %151 = arith.truncf %150 : vector<8x4xf32> to vector<8x4xbf16>
    %cst_44 = arith.constant dense<0.000000e+00> : vector<8x8xf32>
    %152 = tpu.matmul %147, %149, %cst_44 {dimension_numbers = #tpu.dot_dimension_numbers<[1], [1], [0], [0], [0, 0, 1, 0], [], []>} : vector<8x4xbf16>, vector<8x4xbf16>, vector<8x8xf32> -> vector<8x8xf32>
    %cst_45 = arith.constant 5.000000e-01 : f32
    %153 = vector.broadcast %cst_45 : f32 to vector<8x8xf32>
    %154 = arith.mulf %152, %153 : vector<8x8xf32>
    %cst_46 = arith.constant dense<0xFF800000> : vector<8xf32>
    %155 = vector.multi_reduction <maximumf>, %154, %cst_46 [1] : vector<8x8xf32> to vector<8xf32>
    %156 = vector.shape_cast %155 : vector<8xf32> to vector<8x1xf32>
    %157 = vector.broadcast %156 : vector<8x1xf32> to vector<8x8xf32>
    %158 = arith.subf %154, %157 : vector<8x8xf32>
    %159 = math.exp %158 : vector<8x8xf32>
    %cst_47 = arith.constant dense<0.000000e+00> : vector<8xf32>
    %160 = vector.multi_reduction <add>, %159, %cst_47 [1] : vector<8x8xf32> to vector<8xf32>
    %161 = vector.shape_cast %160 : vector<8xf32> to vector<8x1xf32>
    %162 = arith.truncf %159 : vector<8x8xf32> to vector<8x8xbf16>
    %cst_48 = arith.constant dense<0.000000e+00> : vector<8x4xf32>
    %163 = tpu.matmul %162, %151, %cst_48 {dimension_numbers = #tpu.dot_dimension_numbers<[1], [0], [0], [1], [0, 0, 1, 1], [], []>} : vector<8x8xbf16>, vector<8x4xbf16>, vector<8x4xf32> -> vector<8x4xf32>
    %164 = tpu.reciprocal %161 {approx = true} : vector<8x1xf32> -> vector<8x1xf32>
    %165 = vector.broadcast %164 : vector<8x1xf32> to vector<8x4xf32>
    %166 = arith.mulf %163, %165 : vector<8x4xf32>
    %c0_49 = arith.constant 0 : index
    %c0_50 = arith.constant 0 : index
    %c24 = arith.constant 24 : index
    %167 = vector.load %arg2[%c0_49, %c0_50, %c24] : memref<1x8x32xf32, #tpu.memory_space<vmem>>, vector<1x8x4xf32>
    %168 = vector.shape_cast %167 : vector<1x8x4xf32> to vector<8x4xf32>
    %169 = vector.shape_cast %166 : vector<8x4xf32> to vector<1x8x4xf32>
    tpu.vector_store %arg2[%c0_49, %c0_50, %c24], %169 {strides = array<i32>} : memref<1x8x32xf32, #tpu.memory_space<vmem>>, vector<1x8x4xf32>,
    %170 = vector.extract_strided_slice %1 {offsets = [0, 28], sizes = [8, 4], strides = [1, 1]} : vector<8x96xf32> to vector<8x4xf32>
    %171 = arith.truncf %170 : vector<8x4xf32> to vector<8x4xbf16>
    %172 = vector.extract_strided_slice %1 {offsets = [0, 60], sizes = [8, 4], strides = [1, 1]} : vector<8x96xf32> to vector<8x4xf32>
    %173 = arith.truncf %172 : vector<8x4xf32> to vector<8x4xbf16>
    %174 = vector.extract_strided_slice %1 {offsets = [0, 92], sizes = [8, 4], strides = [1, 1]} : vector<8x96xf32> to vector<8x4xf32>
    %175 = arith.truncf %174 : vector<8x4xf32> to vector<8x4xbf16>
    %cst_51 = arith.constant dense<0.000000e+00> : vector<8x8xf32>
    %176 = tpu.matmul %171, %173, %cst_51 {dimension_numbers = #tpu.dot_dimension_numbers<[1], [1], [0], [0], [0, 0, 1, 0], [], []>} : vector<8x4xbf16>, vector<8x4xbf16>, vector<8x8xf32> -> vector<8x8xf32>
    %cst_52 = arith.constant 5.000000e-01 : f32
    %177 = vector.broadcast %cst_52 : f32 to vector<8x8xf32>
    %178 = arith.mulf %176, %177 : vector<8x8xf32>
    %cst_53 = arith.constant dense<0xFF800000> : vector<8xf32>
    %179 = vector.multi_reduction <maximumf>, %178, %cst_53 [1] : vector<8x8xf32> to vector<8xf32>
    %180 = vector.shape_cast %179 : vector<8xf32> to vector<8x1xf32>
    %181 = vector.broadcast %180 : vector<8x1xf32> to vector<8x8xf32>
    %182 = arith.subf %178, %181 : vector<8x8xf32>
    %183 = math.exp %182 : vector<8x8xf32>
    %cst_54 = arith.constant dense<0.000000e+00> : vector<8xf32>
    %184 = vector.multi_reduction <add>, %183, %cst_54 [1] : vector<8x8xf32> to vector<8xf32>
    %185 = vector.shape_cast %184 : vector<8xf32> to vector<8x1xf32>
    %186 = arith.truncf %183 : vector<8x8xf32> to vector<8x8xbf16>
    %cst_55 = arith.constant dense<0.000000e+00> : vector<8x4xf32>
    %187 = tpu.matmul %186, %175, %cst_55 {dimension_numbers = #tpu.dot_dimension_numbers<[1], [0], [0], [1], [0, 0, 1, 1], [], []>} : vector<8x8xbf16>, vector<8x4xbf16>, vector<8x4xf32> -> vector<8x4xf32>
    %188 = tpu.reciprocal %185 {approx = true} : vector<8x1xf32> -> vector<8x1xf32>
    %189 = vector.broadcast %188 : vector<8x1xf32> to vector<8x4xf32>
    %190 = arith.mulf %187, %189 : vector<8x4xf32>
    %c0_56 = arith.constant 0 : index
    %c0_57 = arith.constant 0 : index
    %c28 = arith.constant 28 : index
    %191 = vector.load %arg2[%c0_56, %c0_57, %c28] : memref<1x8x32xf32, #tpu.memory_space<vmem>>, vector<1x8x4xf32>
    %192 = vector.shape_cast %191 : vector<1x8x4xf32> to vector<8x4xf32>
    %193 = vector.shape_cast %190 : vector<8x4xf32> to vector<1x8x4xf32>
    tpu.vector_store %arg2[%c0_56, %c0_57, %c28], %193 {strides = array<i32>} : memref<1x8x32xf32, #tpu.memory_space<vmem>>, vector<1x8x4xf32>,
    return
  }
  func.func @transform_0(%arg0: i32) -> (i32, i32, i32) {
    %c0_i32 = arith.constant 0 : i32
    %c0_i32_0 = arith.constant 0 : i32
    %c0_i32_1 = arith.constant 0 : i32
    return %arg0, %c0_i32, %c0_i32_0 : i32, i32, i32
  }
  func.func @transform_1(%arg0: i32) -> (i32, i32, i32) {
    %c0_i32 = arith.constant 0 : i32
    %c0_i32_0 = arith.constant 0 : i32
    %c0_i32_1 = arith.constant 0 : i32
    return %arg0, %c0_i32, %c0_i32_0 : i32, i32, i32
  }
}

module attributes {stable_mosaic.version = 11 : i64} {
  func.func @_eca_ln_kernel(%arg0: i32, %arg1: memref<1x8x32xf32, #tpu.memory_space<vmem>>, %arg2: memref<32x32xf32, #tpu.memory_space<vmem>>, %arg3: memref<1x32xf32, #tpu.memory_space<vmem>>, %arg4: memref<1x32xf32, #tpu.memory_space<vmem>>, %arg5: memref<1x8x32xf32, #tpu.memory_space<vmem>>) attributes {dimension_semantics = [#tpu.dimension_semantics<parallel>], iteration_bounds = array<i64: 2>, scalar_prefetch = 0 : i64, scratch_operands = 0 : i64, tpu.core_type = #tpu.core_type<tc>, window_params = [{transform_indices = @transform_0, window_bounds = array<i64: 1, 8, 32>}, {pipeline_mode = #tpu.pipeline_mode<synchronous>, transform_indices = @transform_1, window_bounds = array<i64: 32, 32>}, {pipeline_mode = #tpu.pipeline_mode<synchronous>, transform_indices = @transform_2, window_bounds = array<i64: 1, 32>}, {pipeline_mode = #tpu.pipeline_mode<synchronous>, transform_indices = @transform_3, window_bounds = array<i64: 1, 32>}, {transform_indices = @transform_4, window_bounds = array<i64: 1, 8, 32>}]} {
    %c0 = arith.constant 0 : index
    %c0_0 = arith.constant 0 : index
    %c0_1 = arith.constant 0 : index
    %0 = vector.load %arg1[%c0, %c0_0, %c0_1] : memref<1x8x32xf32, #tpu.memory_space<vmem>>, vector<1x8x32xf32>
    %1 = vector.shape_cast %0 : vector<1x8x32xf32> to vector<8x32xf32>
    %cst = arith.constant dense<0.000000e+00> : vector<32xf32>
    %2 = vector.multi_reduction <add>, %1, %cst [0] : vector<8x32xf32> to vector<32xf32>
    %3 = vector.shape_cast %2 : vector<32xf32> to vector<1x32xf32>
    %cst_2 = arith.constant 8.000000e+00 : f32
    %4 = vector.broadcast %cst_2 : f32 to vector<1x32xf32>
    %5 = arith.divf %3, %4 : vector<1x32xf32>
    %6 = arith.truncf %5 : vector<1x32xf32> to vector<1x32xbf16>
    %c0_3 = arith.constant 0 : index
    %c0_4 = arith.constant 0 : index
    %7 = vector.load %arg2[%c0_3, %c0_4] : memref<32x32xf32, #tpu.memory_space<vmem>>, vector<32x32xf32>
    %8 = arith.truncf %7 : vector<32x32xf32> to vector<32x32xbf16>
    %cst_5 = arith.constant dense<0.000000e+00> : vector<1x32xf32>
    %9 = tpu.matmul %6, %8, %cst_5 {dimension_numbers = #tpu.dot_dimension_numbers<[1], [1], [0], [0], [0, 0, 1, 0], [], []>} : vector<1x32xbf16>, vector<32x32xbf16>, vector<1x32xf32> -> vector<1x32xf32>
    %10 = arith.negf %9 : vector<1x32xf32>
    %11 = math.exp %10 : vector<1x32xf32>
    %cst_6 = arith.constant 1.000000e+00 : f32
    %12 = vector.broadcast %cst_6 : f32 to vector<1x32xf32>
    %13 = arith.addf %12, %11 : vector<1x32xf32>
    %14 = arith.divf %12, %13 : vector<1x32xf32>
    %15 = vector.broadcast %14 : vector<1x32xf32> to vector<8x32xf32>
    %16 = arith.mulf %1, %15 : vector<8x32xf32>
    %cst_7 = arith.constant dense<0.000000e+00> : vector<8xf32>
    %17 = vector.multi_reduction <add>, %16, %cst_7 [1] : vector<8x32xf32> to vector<8xf32>
    %18 = vector.shape_cast %17 : vector<8xf32> to vector<8x1xf32>
    %cst_8 = arith.constant 3.200000e+01 : f32
    %19 = vector.broadcast %cst_8 : f32 to vector<8x1xf32>
    %20 = arith.divf %18, %19 : vector<8x1xf32>
    %21 = vector.broadcast %20 : vector<8x1xf32> to vector<8x32xf32>
    %22 = arith.subf %16, %21 : vector<8x32xf32>
    %23 = arith.mulf %22, %22 : vector<8x32xf32>
    %cst_9 = arith.constant dense<0.000000e+00> : vector<8xf32>
    %24 = vector.multi_reduction <add>, %23, %cst_9 [1] : vector<8x32xf32> to vector<8xf32>
    %25 = vector.shape_cast %24 : vector<8xf32> to vector<8x1xf32>
    %cst_10 = arith.constant 3.200000e+01 : f32
    %26 = vector.broadcast %cst_10 : f32 to vector<8x1xf32>
    %27 = arith.divf %25, %26 : vector<8x1xf32>
    %cst_11 = arith.constant 9.99999974E-6 : f32
    %28 = vector.broadcast %cst_11 : f32 to vector<8x1xf32>
    %29 = arith.addf %27, %28 : vector<8x1xf32>
    %30 = math.rsqrt %29 : vector<8x1xf32>
    %31 = vector.broadcast %30 : vector<8x1xf32> to vector<8x32xf32>
    %32 = arith.mulf %22, %31 : vector<8x32xf32>
    %c0_12 = arith.constant 0 : index
    %c0_13 = arith.constant 0 : index
    %33 = vector.load %arg3[%c0_12, %c0_13] : memref<1x32xf32, #tpu.memory_space<vmem>>, vector<1x32xf32>
    %34 = vector.broadcast %33 : vector<1x32xf32> to vector<8x32xf32>
    %35 = arith.mulf %32, %34 : vector<8x32xf32>
    %c0_14 = arith.constant 0 : index
    %c0_15 = arith.constant 0 : index
    %36 = vector.load %arg4[%c0_14, %c0_15] : memref<1x32xf32, #tpu.memory_space<vmem>>, vector<1x32xf32>
    %37 = vector.broadcast %36 : vector<1x32xf32> to vector<8x32xf32>
    %38 = arith.addf %35, %37 : vector<8x32xf32>
    %c0_16 = arith.constant 0 : index
    %c0_17 = arith.constant 0 : index
    %c0_18 = arith.constant 0 : index
    %39 = vector.load %arg5[%c0_16, %c0_17, %c0_18] : memref<1x8x32xf32, #tpu.memory_space<vmem>>, vector<1x8x32xf32>
    %40 = vector.shape_cast %39 : vector<1x8x32xf32> to vector<8x32xf32>
    %41 = vector.shape_cast %38 : vector<8x32xf32> to vector<1x8x32xf32>
    tpu.vector_store %arg5[%c0_16, %c0_17, %c0_18], %41 {strides = array<i32>} : memref<1x8x32xf32, #tpu.memory_space<vmem>>, vector<1x8x32xf32>,
    return
  }
  func.func @transform_0(%arg0: i32) -> (i32, i32, i32) {
    %c0_i32 = arith.constant 0 : i32
    %c0_i32_0 = arith.constant 0 : i32
    %c0_i32_1 = arith.constant 0 : i32
    return %arg0, %c0_i32, %c0_i32_0 : i32, i32, i32
  }
  func.func @transform_1(%arg0: i32) -> (i32, i32) {
    %c0_i32 = arith.constant 0 : i32
    %c0_i32_0 = arith.constant 0 : i32
    %c0_i32_1 = arith.constant 0 : i32
    return %c0_i32, %c0_i32_0 : i32, i32
  }
  func.func @transform_2(%arg0: i32) -> (i32, i32) {
    %c0_i32 = arith.constant 0 : i32
    %c0_i32_0 = arith.constant 0 : i32
    %c0_i32_1 = arith.constant 0 : i32
    return %c0_i32, %c0_i32_0 : i32, i32
  }
  func.func @transform_3(%arg0: i32) -> (i32, i32) {
    %c0_i32 = arith.constant 0 : i32
    %c0_i32_0 = arith.constant 0 : i32
    %c0_i32_1 = arith.constant 0 : i32
    return %c0_i32, %c0_i32_0 : i32, i32
  }
  func.func @transform_4(%arg0: i32) -> (i32, i32, i32) {
    %c0_i32 = arith.constant 0 : i32
    %c0_i32_0 = arith.constant 0 : i32
    %c0_i32_1 = arith.constant 0 : i32
    return %arg0, %c0_i32, %c0_i32_0 : i32, i32, i32
  }
}

module attributes {stable_mosaic.version = 11 : i64} {
  func.func @_matmul_bias_kernel(%arg0: i32, %arg1: i32, %arg2: memref<16x32xf32, #tpu.memory_space<vmem>>, %arg3: memref<64x32xf32, #tpu.memory_space<vmem>>, %arg4: memref<1x64xf32, #tpu.memory_space<vmem>>, %arg5: memref<16x64xf32, #tpu.memory_space<vmem>>) attributes {dimension_semantics = [#tpu.dimension_semantics<parallel>, #tpu.dimension_semantics<parallel>], iteration_bounds = array<i64: 1, 1>, scalar_prefetch = 0 : i64, scratch_operands = 0 : i64, tpu.core_type = #tpu.core_type<tc>, window_params = [{transform_indices = @transform_0, window_bounds = array<i64: 16, 32>}, {transform_indices = @transform_1, window_bounds = array<i64: 64, 32>}, {transform_indices = @transform_2, window_bounds = array<i64: 1, 64>}, {transform_indices = @transform_3, window_bounds = array<i64: 16, 64>}]} {
    %c0 = arith.constant 0 : index
    %c0_0 = arith.constant 0 : index
    %0 = vector.load %arg2[%c0, %c0_0] : memref<16x32xf32, #tpu.memory_space<vmem>>, vector<16x32xf32>
    %1 = arith.truncf %0 : vector<16x32xf32> to vector<16x32xbf16>
    %c0_1 = arith.constant 0 : index
    %c0_2 = arith.constant 0 : index
    %2 = vector.load %arg3[%c0_1, %c0_2] : memref<64x32xf32, #tpu.memory_space<vmem>>, vector<64x32xf32>
    %3 = arith.truncf %2 : vector<64x32xf32> to vector<64x32xbf16>
    %cst = arith.constant dense<0.000000e+00> : vector<16x64xf32>
    %4 = tpu.matmul %1, %3, %cst {dimension_numbers = #tpu.dot_dimension_numbers<[1], [1], [0], [0], [0, 0, 1, 0], [], []>} : vector<16x32xbf16>, vector<64x32xbf16>, vector<16x64xf32> -> vector<16x64xf32>
    %c0_3 = arith.constant 0 : index
    %c0_4 = arith.constant 0 : index
    %5 = vector.load %arg4[%c0_3, %c0_4] : memref<1x64xf32, #tpu.memory_space<vmem>>, vector<1x64xf32>
    %6 = vector.broadcast %5 : vector<1x64xf32> to vector<16x64xf32>
    %7 = arith.addf %4, %6 : vector<16x64xf32>
    %cst_5 = arith.constant 5.000000e-01 : f32
    %8 = vector.broadcast %cst_5 : f32 to vector<16x64xf32>
    %9 = arith.mulf %8, %7 : vector<16x64xf32>
    %cst_6 = arith.constant 4.471500e-02 : f32
    %10 = vector.broadcast %cst_6 : f32 to vector<16x64xf32>
    %11 = arith.mulf %10, %7 : vector<16x64xf32>
    %12 = arith.mulf %11, %7 : vector<16x64xf32>
    %13 = arith.mulf %12, %7 : vector<16x64xf32>
    %14 = arith.addf %7, %13 : vector<16x64xf32>
    %cst_7 = arith.constant 0.797884583 : f32
    %15 = vector.broadcast %cst_7 : f32 to vector<16x64xf32>
    %16 = arith.mulf %15, %14 : vector<16x64xf32>
    %17 = math.tanh %16 : vector<16x64xf32>
    %cst_8 = arith.constant 1.000000e+00 : f32
    %18 = vector.broadcast %cst_8 : f32 to vector<16x64xf32>
    %19 = arith.addf %18, %17 : vector<16x64xf32>
    %20 = arith.mulf %9, %19 : vector<16x64xf32>
    %c0_9 = arith.constant 0 : index
    %c0_10 = arith.constant 0 : index
    %21 = vector.load %arg5[%c0_9, %c0_10] : memref<16x64xf32, #tpu.memory_space<vmem>>, vector<16x64xf32>
    tpu.vector_store %arg5[%c0_9, %c0_10], %20 {strides = array<i32>} : memref<16x64xf32, #tpu.memory_space<vmem>>, vector<16x64xf32>,
    return
  }
  func.func @transform_0(%arg0: i32, %arg1: i32) -> (i32, i32) {
    %c0_i32 = arith.constant 0 : i32
    %c0_i32_0 = arith.constant 0 : i32
    return %arg0, %c0_i32 : i32, i32
  }
  func.func @transform_1(%arg0: i32, %arg1: i32) -> (i32, i32) {
    %c0_i32 = arith.constant 0 : i32
    %c0_i32_0 = arith.constant 0 : i32
    return %arg1, %c0_i32 : i32, i32
  }
  func.func @transform_2(%arg0: i32, %arg1: i32) -> (i32, i32) {
    %c0_i32 = arith.constant 0 : i32
    %c0_i32_0 = arith.constant 0 : i32
    return %c0_i32, %arg1 : i32, i32
  }
  func.func @transform_3(%arg0: i32, %arg1: i32) -> (i32, i32) {
    %c0_i32 = arith.constant 0 : i32
    return %arg0, %arg1 : i32, i32
  }
}

module attributes {stable_mosaic.version = 11 : i64} {
  func.func @_matmul_bias_kernel(%arg0: i32, %arg1: i32, %arg2: memref<16x64xf32, #tpu.memory_space<vmem>>, %arg3: memref<32x64xf32, #tpu.memory_space<vmem>>, %arg4: memref<1x32xf32, #tpu.memory_space<vmem>>, %arg5: memref<16x32xf32, #tpu.memory_space<vmem>>, %arg6: memref<16x32xf32, #tpu.memory_space<vmem>>) attributes {dimension_semantics = [#tpu.dimension_semantics<parallel>, #tpu.dimension_semantics<parallel>], iteration_bounds = array<i64: 1, 1>, scalar_prefetch = 0 : i64, scratch_operands = 0 : i64, tpu.core_type = #tpu.core_type<tc>, window_params = [{transform_indices = @transform_0, window_bounds = array<i64: 16, 64>}, {transform_indices = @transform_1, window_bounds = array<i64: 32, 64>}, {transform_indices = @transform_2, window_bounds = array<i64: 1, 32>}, {transform_indices = @transform_3, window_bounds = array<i64: 16, 32>}, {transform_indices = @transform_4, window_bounds = array<i64: 16, 32>}]} {
    %c0 = arith.constant 0 : index
    %c0_0 = arith.constant 0 : index
    %0 = vector.load %arg2[%c0, %c0_0] : memref<16x64xf32, #tpu.memory_space<vmem>>, vector<16x64xf32>
    %1 = arith.truncf %0 : vector<16x64xf32> to vector<16x64xbf16>
    %c0_1 = arith.constant 0 : index
    %c0_2 = arith.constant 0 : index
    %2 = vector.load %arg3[%c0_1, %c0_2] : memref<32x64xf32, #tpu.memory_space<vmem>>, vector<32x64xf32>
    %3 = arith.truncf %2 : vector<32x64xf32> to vector<32x64xbf16>
    %cst = arith.constant dense<0.000000e+00> : vector<16x32xf32>
    %4 = tpu.matmul %1, %3, %cst {dimension_numbers = #tpu.dot_dimension_numbers<[1], [1], [0], [0], [0, 0, 1, 0], [], []>} : vector<16x64xbf16>, vector<32x64xbf16>, vector<16x32xf32> -> vector<16x32xf32>
    %c0_3 = arith.constant 0 : index
    %c0_4 = arith.constant 0 : index
    %5 = vector.load %arg4[%c0_3, %c0_4] : memref<1x32xf32, #tpu.memory_space<vmem>>, vector<1x32xf32>
    %6 = vector.broadcast %5 : vector<1x32xf32> to vector<16x32xf32>
    %7 = arith.addf %4, %6 : vector<16x32xf32>
    %c0_5 = arith.constant 0 : index
    %c0_6 = arith.constant 0 : index
    %8 = vector.load %arg5[%c0_5, %c0_6] : memref<16x32xf32, #tpu.memory_space<vmem>>, vector<16x32xf32>
    %9 = arith.addf %7, %8 : vector<16x32xf32>
    %c0_7 = arith.constant 0 : index
    %c0_8 = arith.constant 0 : index
    %10 = vector.load %arg6[%c0_7, %c0_8] : memref<16x32xf32, #tpu.memory_space<vmem>>, vector<16x32xf32>
    tpu.vector_store %arg6[%c0_7, %c0_8], %9 {strides = array<i32>} : memref<16x32xf32, #tpu.memory_space<vmem>>, vector<16x32xf32>,
    return
  }
  func.func @transform_0(%arg0: i32, %arg1: i32) -> (i32, i32) {
    %c0_i32 = arith.constant 0 : i32
    %c0_i32_0 = arith.constant 0 : i32
    return %arg0, %c0_i32 : i32, i32
  }
  func.func @transform_1(%arg0: i32, %arg1: i32) -> (i32, i32) {
    %c0_i32 = arith.constant 0 : i32
    %c0_i32_0 = arith.constant 0 : i32
    return %arg1, %c0_i32 : i32, i32
  }
  func.func @transform_2(%arg0: i32, %arg1: i32) -> (i32, i32) {
    %c0_i32 = arith.constant 0 : i32
    %c0_i32_0 = arith.constant 0 : i32
    return %c0_i32, %arg1 : i32, i32
  }
  func.func @transform_3(%arg0: i32, %arg1: i32) -> (i32, i32) {
    %c0_i32 = arith.constant 0 : i32
    return %arg0, %arg1 : i32, i32
  }
  func.func @transform_4(%arg0: i32, %arg1: i32) -> (i32, i32) {
    %c0_i32 = arith.constant 0 : i32
    return %arg0, %arg1 : i32, i32
  }
}

module attributes {stable_mosaic.version = 11 : i64} {
  func.func @_eca_kernel(%arg0: i32, %arg1: memref<1x8x32xf32, #tpu.memory_space<vmem>>, %arg2: memref<32x32xf32, #tpu.memory_space<vmem>>, %arg3: memref<1x8x32xf32, #tpu.memory_space<vmem>>) attributes {dimension_semantics = [#tpu.dimension_semantics<parallel>], iteration_bounds = array<i64: 2>, scalar_prefetch = 0 : i64, scratch_operands = 0 : i64, tpu.core_type = #tpu.core_type<tc>, window_params = [{transform_indices = @transform_0, window_bounds = array<i64: 1, 8, 32>}, {pipeline_mode = #tpu.pipeline_mode<synchronous>, transform_indices = @transform_1, window_bounds = array<i64: 32, 32>}, {transform_indices = @transform_2, window_bounds = array<i64: 1, 8, 32>}]} {
    %c0 = arith.constant 0 : index
    %c0_0 = arith.constant 0 : index
    %c0_1 = arith.constant 0 : index
    %0 = vector.load %arg1[%c0, %c0_0, %c0_1] : memref<1x8x32xf32, #tpu.memory_space<vmem>>, vector<1x8x32xf32>
    %1 = vector.shape_cast %0 : vector<1x8x32xf32> to vector<8x32xf32>
    %cst = arith.constant dense<0.000000e+00> : vector<32xf32>
    %2 = vector.multi_reduction <add>, %1, %cst [0] : vector<8x32xf32> to vector<32xf32>
    %3 = vector.shape_cast %2 : vector<32xf32> to vector<1x32xf32>
    %cst_2 = arith.constant 8.000000e+00 : f32
    %4 = vector.broadcast %cst_2 : f32 to vector<1x32xf32>
    %5 = arith.divf %3, %4 : vector<1x32xf32>
    %6 = arith.truncf %5 : vector<1x32xf32> to vector<1x32xbf16>
    %c0_3 = arith.constant 0 : index
    %c0_4 = arith.constant 0 : index
    %7 = vector.load %arg2[%c0_3, %c0_4] : memref<32x32xf32, #tpu.memory_space<vmem>>, vector<32x32xf32>
    %8 = arith.truncf %7 : vector<32x32xf32> to vector<32x32xbf16>
    %cst_5 = arith.constant dense<0.000000e+00> : vector<1x32xf32>
    %9 = tpu.matmul %6, %8, %cst_5 {dimension_numbers = #tpu.dot_dimension_numbers<[1], [1], [0], [0], [0, 0, 1, 0], [], []>} : vector<1x32xbf16>, vector<32x32xbf16>, vector<1x32xf32> -> vector<1x32xf32>
    %10 = arith.negf %9 : vector<1x32xf32>
    %11 = math.exp %10 : vector<1x32xf32>
    %cst_6 = arith.constant 1.000000e+00 : f32
    %12 = vector.broadcast %cst_6 : f32 to vector<1x32xf32>
    %13 = arith.addf %12, %11 : vector<1x32xf32>
    %14 = arith.divf %12, %13 : vector<1x32xf32>
    %15 = vector.broadcast %14 : vector<1x32xf32> to vector<8x32xf32>
    %16 = arith.mulf %1, %15 : vector<8x32xf32>
    %c0_7 = arith.constant 0 : index
    %c0_8 = arith.constant 0 : index
    %c0_9 = arith.constant 0 : index
    %17 = vector.load %arg3[%c0_7, %c0_8, %c0_9] : memref<1x8x32xf32, #tpu.memory_space<vmem>>, vector<1x8x32xf32>
    %18 = vector.shape_cast %17 : vector<1x8x32xf32> to vector<8x32xf32>
    %19 = vector.shape_cast %16 : vector<8x32xf32> to vector<1x8x32xf32>
    tpu.vector_store %arg3[%c0_7, %c0_8, %c0_9], %19 {strides = array<i32>} : memref<1x8x32xf32, #tpu.memory_space<vmem>>, vector<1x8x32xf32>,
    return
  }
  func.func @transform_0(%arg0: i32) -> (i32, i32, i32) {
    %c0_i32 = arith.constant 0 : i32
    %c0_i32_0 = arith.constant 0 : i32
    %c0_i32_1 = arith.constant 0 : i32
    return %arg0, %c0_i32, %c0_i32_0 : i32, i32, i32
  }
  func.func @transform_1(%arg0: i32) -> (i32, i32) {
    %c0_i32 = arith.constant 0 : i32
    %c0_i32_0 = arith.constant 0 : i32
    %c0_i32_1 = arith.constant 0 : i32
    return %c0_i32, %c0_i32_0 : i32, i32
  }
  func.func @transform_2(%arg0: i32) -> (i32, i32, i32) {
    %c0_i32 = arith.constant 0 : i32
    %c0_i32_0 = arith.constant 0 : i32
    %c0_i32_1 = arith.constant 0 : i32
    return %arg0, %c0_i32, %c0_i32_0 : i32, i32, i32
  }
}

</mosaic_0001>

<bundles_post_ra>
// kernel: block_forward.11
= control target key start
LH: loop header
LB: loop body
LE: loop exit
PB: predicated region body
PF: predicated region fallthrough
CT: control target
= control target key end

     0   :  { %v110_v0 = vmov 0.0   ;;  %vm34_vm0 = vcmask 261120   ;;  %vm111_vm1 = vmmov 0   ;;  %s175_s1 = inlined_call_operand.vmem [shape: f32[32,32], index: 1, kind: input, shape index: {}]   ;;  %s176_s0 = inlined_call_operand.vmem [shape: f32[16,32], index: 0, kind: input, shape index: {}]   ;;  %s177_s2 = inlined_call_operand.vmem [shape: f32[1,32], index: 2, kind: input, shape index: {}]   ;;  %s178_s3 = inlined_call_operand.vmem [shape: f32[16,32], index: 3, kind: input, shape index: {}]   ;;  %s179_s4 = inlined_call_operand.vmem [shape: f32[16,32], index: 4, kind: output, shape index: {}]  }
   0x1   :  { %100 = vmatprep.subr.bf16.mxu0 %v110_v0  ;;  %v21_v1 = vld [vmem:[%s175_s1] sm:$0xff]  ;;  %v22_v2 = vld [vmem:[%s175_s1 + $0x8] sm:$0xff]  ;;  %104 = vmatprep.mubr.msk.bf16.mxu0 %vm111_vm1, %v110_v0  ;;  %v23_v4 = vld [vmem:[%s175_s1 + $0x10] sm:$0xff] }
   0x2   :  { %v25_v3 = vpack.c.bf16 %v22_v2, %v21_v1  ;;  %v24_v5 = vld [vmem:[%s175_s1 + $0x18] sm:$0xff]  ;;  %v18_v9 = vld [vmem:[%s176_s0] sm:$0xff]  ;;  %v19_v10 = vld [vmem:[%s176_s0 + $0x8] sm:$0xff] }
   0x3   :  { %v26_v7 = vpack.c.bf16 %v24_v5, %v23_v4  ;;  %v20_v11 = vpack.c.bf16 %v19_v10, %v18_v9  ;;  %v95_v12 = vld [vmem:[%s177_s2] ss:$0 sm:$0xff]  ;;  %v86_v18 = vld [vmem:[%s178_s3 + $0x8] sm:$0xff] }
   0x4   :  { %v39_v6 = vsel %vm34_vm0, %v25_v3, 0  ;;  %v85_v14 = vld [vmem:[%s178_s3] sm:$0xff] }
   0x5   :  { %101 = vmatpush3.bf16.xpose.msra.mxu0 %v39_v6  ;;  %v42_v8 = vsel %vm34_vm0, %v26_v7, 0 }
   0x6   :  { %102 = vmatprep.subr.bf16.mxu0 %v110_v0 }
   0xd   :  { %103 = vmatpush3.bf16.xpose.msra.mxu0 %v42_v8 }
  0x14   :  { %105 = vmatmul.mubr.msk.bf16.vlgmr.msra.gmra.mrb[0].mxu0 %vm34_vm0, %v20_v11 }
  0xe7   :  { %v78_v13 = vpop.f32.mrb[0].mxu0 }
  0xe8   :  { %v79_v15 = vadd.f32 %v95_v12, %v78_v13  ;;  %v106_v16 = vpop.f32.mrb[1].mxu0 }
  0xe9   :  { %v81_v17 = vpop.f32.mrb[2].mxu0 }
  0xea   :  { %v87_v19 = vadd.f32 %v85_v14, %v79_v15  ;;  %v82_v20 = vadd.f32 %v95_v12, %v81_v17  ;;  %v107_v21 = vpop.f32.mrb[3].mxu0 }
  0xec   :  { %89 = vst.msk [vmem:[%s179_s4] sm:$0xff] %vm34_vm0, %v87_v19  ;;  %v88_v22 = vadd.f32 %v86_v18, %v82_v20 }
  0xee   :  { %90 = vst.msk [vmem:[%s179_s4 + $0x8] sm:$0xff] %vm34_vm0, %v88_v22 }

// kernel: block_forward.9
= control target key start
LH: loop header
LB: loop body
LE: loop exit
PB: predicated region body
PF: predicated region fallthrough
CT: control target
= control target key end

     0   :  { %v140_v0 = vmov 0.0   ;;  %vm43_vm0 = vcmask 261120   ;;  %vm141_vm1 = vmmov 0   ;;  %vm106_vm2 = vcmask 785408   ;;  %s220_s1 = inlined_call_operand.vmem [shape: f32[96,32], index: 1, kind: input, shape index: {}]   ;;  %s221_s0 = inlined_call_operand.vmem [shape: f32[16,32], index: 0, kind: input, shape index: {}]   ;;  %s222_s2 = inlined_call_operand.vmem [shape: f32[1,96], index: 2, kind: input, shape index: {}]   ;;  %s223_s3 = inlined_call_operand.vmem [shape: f32[16,96], index: 3, kind: output, shape index: {}]  }
   0x1   :  { %122 = vmatprep.subr.bf16.mxu0 %v140_v0  ;;  %v18_v1 = vld [vmem:[%s220_s1] sm:$0xff]  ;;  %v19_v2 = vld [vmem:[%s220_s1 + $0x8] sm:$0xff]  ;;  %134 = vmatprep.mubr.msk.bf16.mxu0 %vm141_vm1, %v140_v0  ;;  %v20_v4 = vld [vmem:[%s220_s1 + $0x10] sm:$0xff] }
   0x2   :  { %v30_v3 = vpack.c.bf16 %v19_v2, %v18_v1  ;;  %v21_v5 = vld [vmem:[%s220_s1 + $0x18] sm:$0xff]  ;;  %v22_v9 = vld [vmem:[%s220_s1 + $0x20] sm:$0xff]  ;;  %v23_v10 = vld [vmem:[%s220_s1 + $0x28] sm:$0xff] }
   0x3   :  { %v31_v7 = vpack.c.bf16 %v21_v5, %v20_v4  ;;  %v32_v11 = vpack.c.bf16 %v23_v10, %v22_v9  ;;  %v24_v13 = vld [vmem:[%s220_s1 + $0x30] sm:$0xff]  ;;  %v25_v14 = vld [vmem:[%s220_s1 + $0x38] sm:$0xff]  ;;  %v26_v17 = vld [vmem:[%s220_s1 + $0x40] sm:$0xff] }
   0x4   :  { %v48_v6 = vsel %vm43_vm0, %v30_v3, 0  ;;  %v33_v15 = vpack.c.bf16 %v25_v14, %v24_v13  ;;  %v27_v18 = vld [vmem:[%s220_s1 + $0x48] sm:$0xff]  ;;  %v28_v21 = vld [vmem:[%s220_s1 + $0x50] sm:$0xff]  ;;  %v29_v22 = vld [vmem:[%s220_s1 + $0x58] sm:$0xff] }
   0x5   :  { %123 = vmatpush3.bf16.xpose.msra.mxu0 %v48_v6  ;;  %v51_v8 = vsel %vm43_vm0, %v31_v7, 0  ;;  %v54_v12 = vsel %vm43_vm0, %v32_v11, 0  ;;  %v34_v19 = vpack.c.bf16 %v27_v18, %v26_v17  ;;  %v35_v23 = vpack.c.bf16 %v29_v22, %v28_v21  ;;  %v15_v25 = vld [vmem:[%s221_s0] sm:$0xff]  ;;  %v16_v26 = vld [vmem:[%s221_s0 + $0x8] sm:$0xff] }
   0x6   :  { %124 = vmatprep.subr.bf16.mxu0 %v140_v0  ;;  %v57_v16 = vsel %vm43_vm0, %v33_v15, 0  ;;  %v17_v27 = vpack.c.bf16 %v16_v26, %v15_v25  ;;  %v113_v28 = vld [vmem:[%s222_s2] ss:$0 sm:$0xff] }
   0x7   :  { %v60_v20 = vsel %vm43_vm0, %v34_v19, 0  ;;  %v63_v24 = vsel %vm43_vm0, %v35_v23, 0 }
   0xd   :  { %125 = vmatpush3.bf16.xpose.msra.mxu0 %v51_v8 }
   0xe   :  { %126 = vmatprep.subr.bf16.mxu0 %v140_v0 }
  0x15   :  { %127 = vmatpush3.bf16.xpose.msra.mxu0 %v54_v12 }
  0x16   :  { %128 = vmatprep.subr.bf16.mxu0 %v140_v0 }
  0x1d   :  { %129 = vmatpush3.bf16.xpose.msra.mxu0 %v57_v16 }
  0x1e   :  { %130 = vmatprep.subr.bf16.mxu0 %v140_v0 }
  0x25   :  { %131 = vmatpush3.bf16.xpose.msra.mxu0 %v60_v20 }
  0x26   :  { %132 = vmatprep.subr.bf16.mxu0 %v140_v0 }
  0x2d   :  { %133 = vmatpush3.bf16.xpose.msra.mxu0 %v63_v24 }
  0x34   :  { %135 = vmatmul.mubr.msk.bf16.vlgmr.msra.gmra.mrb[0].mxu0 %vm43_vm0, %v17_v27 }
 0x107   :  { %v99_v29 = vpop.f32.mrb[0].mxu0 }
 0x108   :  { %v100_v30 = vadd.f32 %v113_v28, %v99_v29  ;;  %v136_v31 = vpop.f32.mrb[1].mxu0 }
 0x109   :  { %v102_v32 = vpop.f32.mrb[2].mxu0 }
 0x10a   :  { %107 = vst.msk [vmem:[%s223_s3] sm:$0xff] %vm106_vm2, %v100_v30  ;;  %v103_v33 = vadd.f32 %v113_v28, %v102_v32  ;;  %v137_v34 = vpop.f32.mrb[3].mxu0 }
 0x10c   :  { %108 = vst.msk [vmem:[%s223_s3 + $0x8] sm:$0xff] %vm106_vm2, %v103_v33 }

// kernel: block_forward.8
= control target key start
LH: loop header
LB: loop body
LE: loop exit
PB: predicated region body
PF: predicated region fallthrough
CT: control target
= control target key end

     0   :  { %s431_s15 = smov 0   ;;  %s480_s0 = inlined_call_operand.vmem [shape: f32[2,8,32], index: 0, kind: input, shape index: {}]   ;;  %s481_s1 = inlined_call_operand.vmem [shape: f32[1,32], index: 1, kind: input, shape index: {}]   ;;  %s482_s2 = inlined_call_operand.vmem [shape: f32[1,32], index: 2, kind: input, shape index: {}]   ;;  %s483_s3 = inlined_call_operand.vmem [shape: f32[32,32], index: 3, kind: input, shape index: {}]   ;;  %s484_s4 = inlined_call_operand.vmem [shape: f32[2,8,32], index: 4, kind: output, shape index: {}]  }
   0x1 LB: > { %s356_s16 = sadd.s32 4294967295, %s402_s15   ;;  %p360_p0 = scmp.ge.s32.totalorder %s402_s15, 1  ;;  %s402_s15 = sphi %s431_s15, %s14_s15  }
   0x2   : > { %p161_p1 = scmp.lt.s32.totalorder %s402_s15, 3 }
   0x4   : > { %p162_p2 = pnand %p360_p0, %p161_p1 }
   0x5   : > { %p185_p3 = scmp.lt.s32.totalorder (!%p162_p2), %s356_s16, 1  ;;  %vm195_vm0 = vcmask (!%p162_p2), 261120   ;;  %v236_v7 = vld [vmem:[%s483_s3] sm:$0xff] (!%p162_p2)  ;;  %v237_v8 = vld [vmem:[%s483_s3 + $0x8] sm:$0xff] (!%p162_p2)  ;;  %v404_v9 = vmov (!%p162_p2), 0.0   ;;  %vm405_vm1 = vmmov (!%p162_p2), 0   ;;  %v297_v41 = vlaneseq (!%p162_p2) }
   0x6   : > { %165 = sbr.rel (%p162_p2) target bundleno = 590 (0x24e), region = 36  ;;  %372 = vmatprep.subr.bf16.mxu0 (!%p162_p2), %v404_v9  ;;  %v240_v10 = vpack.c.bf16 (!%p162_p2), %v237_v8, %v236_v7  ;;  %376 = vmatprep.mubr.msk.bf16.mxu0 (!%p162_p2), %vm405_vm1, %v404_v9  ;;  %v238_v11 = vld [vmem:[%s483_s3 + $0x10] sm:$0xff] (!%p162_p2)  ;;  %v239_v12 = vld [vmem:[%s483_s3 + $0x18] sm:$0xff] (!%p162_p2)  ;;  %v363_v20 = vld [vmem:[%s481_s1] ss:$0 sm:$0xff] (!%p162_p2) }
   0x7   : > { %v241_v14 = vpack.c.bf16 (!%p162_p2), %v239_v12, %v238_v11  ;;  %v364_v22 = vld [vmem:[%s482_s2] ss:$0 sm:$0xff] (!%p162_p2)  ;;  %v298_v42 = vshrl.u32 (!%p162_p2), %v297_v41, 7 }
   0x8   : > { %v246_v13 = vsel (!%p162_p2), %vm195_vm0, %v240_v10, 0 }
   0x9   : > { %373 = vmatpush3.bf16.xpose.msra.mxu0 (!%p162_p2), %v246_v13  ;;  %v249_v15 = vsel (!%p162_p2), %vm195_vm0, %v241_v14, 0  ;;  %v299_v43 = vsub.s32 (!%p162_p2), 0, %v298_v42 }
   0xa   : > { %374 = vmatprep.subr.bf16.mxu0 (!%p162_p2), %v404_v9 }
   0xd   : > { %s486_s16 = smov (!%p185_p3, %s356_s16), 1 }
   0xe   : > { %s361_s17 = sshll.u32 %s486_s16, 3 }
   0xf   : > { %s188_s20 = scalar_lea.vmem %s480_s0, %s361_s17  ;;  %s192_s9 = scalar_lea.vmem %s484_s4, %s361_s17 }
  0x10   : > { %v194_v0 = vld [vmem:[%s188_s20] sm:$0xff] }
  0x11   : > { %v196_v1 = vsel %vm195_vm0, %v194_v0, 0.0  ;;  %375 = vmatpush3.bf16.xpose.msra.mxu0 %v249_v15 }
  0x12   : > { %197 = vadd.xlane.f32.xlu0 %v196_v1 }
  0x9f   : > { %v198_v2 = vpop.xlane.xlu0 %197 }
  0xa0   : > { %v200_v3 = vmul.f32 0.03125, %v198_v2 }
  0xa2   : > { %v201_v4 = vsub.f32 %v194_v0, %v200_v3 }
  0xa4   : > { %v202_v5 = vmul.f32 %v201_v4, %v201_v4 }
  0xa6   : > { %v203_v6 = vsel %vm195_vm0, %v202_v5, 0.0 }
  0xa7   : > { %204 = vadd.xlane.f32.xlu0 %v203_v6 }
 0x134   : > { %v205_v16 = vpop.xlane.xlu0 %204 }
 0x135   : > { %v206_v17 = vmul.f32 0.03125, %v205_v16 }
 0x137   : > { %v207_v18 = vadd.f32 1e-05, %v206_v17 }
 0x139   : > { %390 = vrsqrt.f32 %v207_v18 }
 0x143   : > { %v391_v19 = vpop.eup %390 }
 0x144   : > { %v209_v21 = vmul.f32 %v391_v19, %v201_v4 }
 0x146   : > { %v217_v23 = vmul.f32 %v363_v20, %v209_v21 }
 0x148   : > { %v225_v24 = vadd.f32 %v364_v22, %v217_v23 }
 0x14a   : > { %v226_v25 = vsel %vm195_vm0, %v225_v24, 0.0 }
 0x14b   : > { %v227_v26 = vrot.slane %v226_v25, 4 }
 0x14d   : > { %v228_v27 = vadd.f32 %v227_v26, %v226_v25 }
 0x14f   : > { %v229_v28 = vrot.slane %v228_v27, 2 }
 0x151   : > { %v230_v29 = vadd.f32 %v229_v28, %v228_v27 }
 0x153   : > { %v231_v30 = vrot.slane %v230_v29, 1 }
 0x155   : > { %v232_v31 = vadd.f32 %v231_v30, %v230_v29 }
 0x157   : > { %v234_v32 = vmul.f32 0.125, %v232_v31 }
 0x159   : > { %v235_v33 = vpack.c.bf16 %v234_v32, %v234_v32 }
 0x15b   : > { %377 = vmatmul.mubr.msk.bf16.vlgmr.msra.gmra.mrb[0].mxu0 %vm195_vm0, %v235_v33 }
 0x22e   : > { %v285_v34 = vpop.f32.mrb[0].mxu0 }
 0x22f   : > { %v366_v35 = vmul.f32 -1.442695, %v285_v34  ;;  %v378_v36 = vpop.f32.mrb[1].mxu0 }
 0x230   : > { %v288_v37 = vpop.f32.mrb[2].mxu0 }
 0x231   : > { %392 = vpow2.f32 %v366_v35  ;;  %v379_v38 = vpop.f32.mrb[3].mxu0 }
 0x23b   : > { %v393_v39 = vpop.eup %392 }
 0x23c   : > { %v294_v40 = vadd.f32 1.0, %v393_v39 }
 0x23e   : > { %394 = vrcp.f32 %v294_v40 }
 0x248   : > { %v395_v44 = vpop.eup %394 }
 0x249   : > { %v300_v45 = vrot.slane %v395_v44, %v299_v43 }
 0x24b   : > { %v301_v46 = vmul.f32 %v300_v45, %v225_v24 }
 0x24d   : > { %302 = vst.msk [vmem:[%s192_s9] sm:$0xff] %vm195_vm0, %v301_v46 }
 0x24e PF: > { %s14_s15 = sadd.s32 1, %s402_s15  }
 0x24f   : > { %p11_p4 = scmp.ge.s32.totalorder %s14_s15, 4  }
 0x251   :  { %13 = sbr.rel (!%p11_p4) target bundleno = 1 (0x1), region = 66 }

// kernel: block_forward.10
= control target key start
LH: loop header
LB: loop body
LE: loop exit
PB: predicated region body
PF: predicated region fallthrough
CT: control target
= control target key end

     0   :  { %s1376_s6 = smov 0   ;;  %s1541_s0 = inlined_call_operand.vmem [shape: f32[2,8,96], index: 0, kind: input, shape index: {}]   ;;  %s1542_s1 = inlined_call_operand.vmem [shape: f32[2,8,32], index: 1, kind: output, shape index: {}]  }
   0x1 LB: > { %s1101_s7 = sadd.s32 4294967295, %s1332_s6   ;;  %p1105_p0 = scmp.ge.s32.totalorder %s1332_s6, 1  ;;  %s1332_s6 = sphi %s1376_s6, %s11_s6  }
   0x2   : > { %p86_p1 = scmp.lt.s32.totalorder %s1332_s6, 3 }
   0x4   : > { %p87_p2 = pnand %p1105_p0, %p86_p1 }
   0x5   : > { %p104_p3 = scmp.lt.s32.totalorder (!%p87_p2), %s1101_s7, 1  ;;  %v1334_v0 = vmov (!%p87_p2), 0.0   ;;  %vm1335_vm0 = vmmov (!%p87_p2), 0   ;;  %s1336_s12 = smov (!%p87_p2), 96   ;;  %vm118_vm1 = vcmask (!%p87_p2), 31744   ;;  %vm166_vm2 = vcmask (!%p87_p2), 64512  }
   0x6   : > { %90 = sbr.rel (%p87_p2) target bundleno = 1321 (0x529), region = 24  ;;  %1158 = vmatprep.subr.bf16.mxu0 (!%p87_p2), %v1334_v0  ;;  %1160 = vmatprep.mubr.msk.bf16.mxu0 (!%p87_p2), %vm1335_vm0, %v1334_v0  ;;  %s1337_s13 = smov (!%p87_p2), 64   ;;  %vm182_vm3 = vcmask (!%p87_p2), 1043456   ;;  %vm344_vm4 = vcmask (!%p87_p2), 64544   ;;  %vm461_vm5 = vcmask (!%p87_p2), 97344   ;;  %vm578_vm6 = vcmask (!%p87_p2), 130144  }
   0x7   : > { %1164 = vmatprep.subr.bf16.mxu1 (!%p87_p2), %v1334_v0  ;;  %1166 = vmatprep.mubr.msk.bf16.mxu1 (!%p87_p2), %vm1335_vm0, %v1334_v0  ;;  %s1338_s14 = smov (!%p87_p2), 92   ;;  %s1339_s15 = smov (!%p87_p2), 124   ;;  %vm695_vm7 = vcmask (!%p87_p2), 162944   ;;  %vm812_vm8 = vcmask (!%p87_p2), 195744   ;;  %vm929_vm9 = vcmask (!%p87_p2), 228544   ;;  %vm1046_vm10 = vcmask (!%p87_p2), 261344  }
   0x8   : > { %s1340_s16 = smov (!%p87_p2), 88   ;;  %s1341_s17 = smov (!%p87_p2), 120  }
   0x9   : > { %s1342_s18 = smov (!%p87_p2), 84   ;;  %s1343_s19 = smov (!%p87_p2), 116  }
   0xa   : > { %s1344_s20 = smov (!%p87_p2), 80   ;;  %s1345_s21 = smov (!%p87_p2), 112  }
   0xb   : > { %s1346_s22 = smov (!%p87_p2), 108   ;;  %s1347_s23 = smov (!%p87_p2), 72  }
   0xc   : > { %s1348_s24 = smov (!%p87_p2), 104   ;;  %s1349_s25 = smov (!%p87_p2), 68  }
   0xd   : > { %s1544_s7 = smov (!%p104_p3, %s1101_s7), 1  ;;  %s1350_s26 = smov 100  }
   0xe   : > { %s1106_s8 = sshll.u32 %s1544_s7, 3  ;;  %s1351_s27 = smov 76  }
   0xf   : > { %s107_s11 = scalar_lea.vmem %s1541_s0, %s1106_s8  ;;  %s1352_s28 = smov 60  }
  0x10   : > { %v113_v1 = vld [vmem:[%s107_s11] sm:$0xff]  ;;  %s1353_s29 = smov 56   ;;  %s1354_s30 = smov 48  }
  0x11   : > { %v1398_v2 = vpack.c.bf16 %v113_v1, %v113_v1  ;;  %s1355_s2 = smov 52   ;;  %s1356_s3 = smov 40  }
  0x12   : > { %s1357_s4 = smov 36   ;;  %s1358_s5 = smov 44  }
  0x13   : > { %116 = vrot.lane.b32.xlu0 %v1398_v2, %s1336_s12  ;;  %177 = vrot.lane.b32.xlu1 %v1398_v2, %s1337_s13  ;;  %s1359_s9 = smov 4   ;;  %s1360_s10 = smov 8  }
  0x14   : > { %s1526_s13 = scalar_lea.vmem %s1542_s1, %s1106_s8  ;;  %s1361_s7 = smov 12  }
  0x15   : > { %s1362_s8 = smov 16  }
  0x17   : > { %231 = vrot.lane.b32.xlu1 %v1398_v2, %s1338_s14  ;;  %s1363_s14 = smov 20  }
  0x1b   : > { %229 = vrot.lane.b32.xlu1 %v1398_v2, %s1339_s15  ;;  %s1364_s15 = smov 24  }
  0x1f   : > { %348 = vrot.lane.b32.xlu1 %v1398_v2, %s1340_s16  ;;  %s1365_s16 = smov 28  }
  0x23   : > { %346 = vrot.lane.b32.xlu1 %v1398_v2, %s1341_s17 }
  0x27   : > { %465 = vrot.lane.b32.xlu1 %v1398_v2, %s1342_s18 }
  0x2b   : > { %463 = vrot.lane.b32.xlu1 %v1398_v2, %s1343_s19 }
  0x2f   : > { %582 = vrot.lane.b32.xlu1 %v1398_v2, %s1344_s20 }
  0x33   : > { %580 = vrot.lane.b32.xlu1 %v1398_v2, %s1345_s21 }
  0x37   : > { %697 = vrot.lane.b32.xlu1 %v1398_v2, %s1346_s22 }
  0x3b   : > { %816 = vrot.lane.b32.xlu1 %v1398_v2, %s1347_s23 }
  0x3f   : > { %814 = vrot.lane.b32.xlu1 %v1398_v2, %s1348_s24 }
  0x43   : > { %933 = vrot.lane.b32.xlu1 %v1398_v2, %s1349_s25 }
  0x47   : > { %931 = vrot.lane.b32.xlu1 %v1398_v2, %s1350_s26 }
  0x4b   : > { %290 = vrot.lane.b32.xlu1 %v1398_v2, %s1352_s28 }
  0x85   : > { %v117_v3 = vpop.permute.xlu0 %116  ;;  %v178_v11 = vpop.permute.xlu1 %177 }
  0x86   : > { %v123_v4 = vsel %vm118_vm1, %v117_v3, 0  ;;  %v184_v12 = vsel %vm182_vm3, %v178_v11, 0 }
  0x87   : > { %1159 = vmatpush3.bf16.xpose.msra.mxu0 %v123_v4  ;;  %1165 = vmatpush3.bf16.msra.mxu1 %v184_v12 }
  0x88   : > { %1176 = vmatprep.subr.bf16.mxu0 %v1334_v0  ;;  %1170 = vmatprep.subr.bf16.mxu1 %v1334_v0 }
  0x89   : > { %v232_v16 = vpop.permute.xlu1 %231 }
  0x8a   : > { %v237_v19 = vsel %vm118_vm1, %v232_v16, 0 }
  0x8d   : > { %v230_v17 = vpop.permute.xlu1 %229 }
  0x8e   : > { %1161 = vmatmul.mubr.msk.bf16.vlgmr.msra.gmra.mrb[0].mxu0 %vm118_vm1, %v1398_v2 }
  0x8f   : > { %1178 = vmatprep.mubr.msk.bf16.mxu0 %vm1335_vm0, %v1334_v0 }
  0x91   : > { %v349_v21 = vpop.permute.xlu1 %348 }
  0x92   : > { %v354_v23 = vsel %vm118_vm1, %v349_v21, 0 }
  0x95   : > { %v347_v22 = vpop.permute.xlu1 %346 }
  0x99   : > { %v466_v24 = vpop.permute.xlu1 %465 }
  0x9a   : > { %v471_v26 = vsel %vm118_vm1, %v466_v24, 0 }
  0x9d   : > { %v464_v25 = vpop.permute.xlu1 %463 }
  0xa1   : > { %v583_v27 = vpop.permute.xlu1 %582 }
  0xa2   : > { %v588_v28 = vsel %vm118_vm1, %v583_v27, 0 }
  0xa5   : > { %v581_v29 = vpop.permute.xlu1 %580 }
  0xa9   : > { %v698_v31 = vpop.permute.xlu1 %697 }
  0xad   : > { %v817_v33 = vpop.permute.xlu1 %816 }
  0xae   : > { %v822_v34 = vsel %vm118_vm1, %v817_v33, 0 }
  0xb1   : > { %v815_v35 = vpop.permute.xlu1 %814 }
  0xb5   : > { %v934_v36 = vpop.permute.xlu1 %933 }
  0xb6   : > { %v939_v37 = vsel %vm118_vm1, %v934_v36, 0 }
  0xb9   : > { %v932_v38 = vpop.permute.xlu1 %931 }
  0xbd   : > { %v291_v39 = vpop.permute.xlu1 %290 }
  0xbe   : > { %v296_v40 = vsel %vm182_vm3, %v291_v39, 0 }
  0xbf   : > { %1177 = vmatpush3.bf16.msra.mxu0 %v296_v40 }
  0xc0   : > { %1188 = vmatprep.subr.bf16.mxu0 %v1334_v0 }
 0x161   : > { %v159_v5 = vpop.f32.mrb[0].mxu0 }
 0x162   : > { %v165_v6 = vmul.f32 0.5, %v159_v5  ;;  %v1162_v7 = vpop.f32.mrb[1].mxu0 }
 0x163   : > { %v162_v8 = vpop.f32.mrb[2].mxu0 }
 0x164   : > { %v1163_v9 = vpop.f32.mrb[3].mxu0  ;;  %v167_v10 = vsel %vm166_vm2, %v165_v6, -inf }
 0x165   : > { %168 = vmax.xlane.f32.xlu0 %v167_v10 }
 0x17b   : > { %699 = vrot.lane.b32.xlu0 %v1398_v2, %s1351_s27 }
 0x17f   : > { %407 = vrot.lane.b32.xlu0 %v1398_v2, %s1353_s29 }
 0x1f2   : > { %v169_v13 = vpop.xlane.xlu0 %168 }
 0x1f3   : > { %v170_v14 = vsub.f32 %v165_v6, %v169_v13 }
 0x1f5   : > { %v171_v15 = vmul.f32 1.442695, %v170_v14 }
 0x1f6   : > { %v700_v30 = vpop.permute.xlu0 %699 }
 0x1f7   : > { %1294 = vpow2.f32 %v171_v15  ;;  %v705_v32 = vsel %vm118_vm1, %v700_v30, 0 }
 0x201   : > { %v1427_v18 = vpop.eup %1294 }
 0x202   : > { %v176_v20 = vpack.c.bf16 %v1427_v18, %v1427_v18 }
 0x204   : > { %1167 = vmatmul.mubr.msk.bf16.vlgmr.msra.gmra.mrb[0].mxu1 %vm166_vm2, %v176_v20 }
 0x205   : > { %1171 = vmatpush3.bf16.xpose.msra.mxu1 %v237_v19  ;;  %1172 = vmatprep.mubr.msk.bf16.mxu1 %vm1335_vm0, %v1334_v0 }
 0x206   : > { %1182 = vmatprep.subr.bf16.mxu1 %v1334_v0 }
 0x20c   : > { %1173 = vmatmul.mubr.msk.bf16.vlgmr.msra.gmra.mrb[4].mxu1 %vm118_vm1, %v230_v17 }
 0x20d   : > { %1183 = vmatpush3.bf16.xpose.msra.mxu1 %v354_v23  ;;  %1184 = vmatprep.mubr.msk.bf16.mxu1 %vm1335_vm0, %v1334_v0 }
 0x20e   : > { %1194 = vmatprep.subr.bf16.mxu1 %v1334_v0 }
 0x214   : > { %1185 = vmatmul.mubr.msk.bf16.vlgmr.msra.gmra.mrb[8].mxu1 %vm118_vm1, %v347_v22 }
 0x215   : > { %1195 = vmatpush3.bf16.xpose.msra.mxu1 %v471_v26  ;;  %1196 = vmatprep.mubr.msk.bf16.mxu1 %vm1335_vm0, %v1334_v0 }
 0x216   : > { %1206 = vmatprep.subr.bf16.mxu1 %v1334_v0 }
 0x21c   : > { %1197 = vmatmul.mubr.msk.bf16.vlgmr.msra.gmra.mrb[12].mxu1 %vm118_vm1, %v464_v25 }
 0x21d   : > { %1207 = vmatpush3.bf16.xpose.msra.mxu1 %v588_v28  ;;  %1208 = vmatprep.mubr.msk.bf16.mxu1 %vm1335_vm0, %v1334_v0 }
 0x21e   : > { %1218 = vmatprep.subr.bf16.mxu1 %v1334_v0 }
 0x224   : > { %1209 = vmatmul.mubr.msk.bf16.vlgmr.msra.gmra.mrb[16].mxu1 %vm118_vm1, %v581_v29  ;;  %v408_v29 = vpop.permute.xlu0 %407 }
 0x225   : > { %1219 = vmatpush3.bf16.xpose.msra.mxu1 %v705_v32  ;;  %1220 = vmatprep.mubr.msk.bf16.mxu1 %vm1335_vm0, %v1334_v0  ;;  %v413_v36 = vsel %vm182_vm3, %v408_v29, 0 }
 0x226   : > { %1230 = vmatprep.subr.bf16.mxu1 %v1334_v0 }
 0x22c   : > { %1221 = vmatmul.mubr.msk.bf16.vlgmr.msra.gmra.mrb[20].mxu1 %vm118_vm1, %v698_v31 }
 0x22d   : > { %1231 = vmatpush3.bf16.xpose.msra.mxu1 %v822_v34  ;;  %1232 = vmatprep.mubr.msk.bf16.mxu1 %vm1335_vm0, %v1334_v0 }
 0x22e   : > { %1242 = vmatprep.subr.bf16.mxu1 %v1334_v0 }
 0x234   : > { %1233 = vmatmul.mubr.msk.bf16.vlgmr.msra.gmra.mrb[24].mxu1 %vm118_vm1, %v815_v35 }
 0x235   : > { %1243 = vmatpush3.bf16.xpose.msra.mxu1 %v939_v37  ;;  %1244 = vmatprep.mubr.msk.bf16.mxu1 %vm1335_vm0, %v1334_v0 }
 0x23c   : > { %1245 = vmatmul.mubr.msk.bf16.vlgmr.msra.gmra.mrb[28].mxu1 %vm118_vm1, %v932_v38 }
 0x2d7   : > { %v1468_v41 = vpop.f32.mrb[0].mxu1 }
 0x2d8   : > { %v1168_v42 = vpop.f32.mrb[1].mxu1 }
 0x2d9   : > { %v223_v43 = vpop.f32.mrb[2].mxu1 }
 0x2da   : > { %v1169_v44 = vpop.f32.mrb[3].mxu1 }
 0x2df   : > { %v273_v45 = vpop.f32.mrb[4].mxu1 }
 0x2e0   : > { %v279_v46 = vmul.f32 0.5, %v273_v45  ;;  %v1174_v47 = vpop.f32.mrb[5].mxu1 }
 0x2e1   : > { %v276_v48 = vpop.f32.mrb[6].mxu1 }
 0x2e2   : > { %v1175_v49 = vpop.f32.mrb[7].mxu1  ;;  %v280_v50 = vsel %vm166_vm2, %v279_v46, -inf }
 0x2e3   : > { %281 = vmax.xlane.f32.xlu1 %v280_v50 }
 0x2e7   : > { %v390_v51 = vpop.f32.mrb[8].mxu1 }
 0x2e8   : > { %v396_v52 = vmul.f32 0.5, %v390_v51  ;;  %v1186_v53 = vpop.f32.mrb[9].mxu1 }
 0x2e9   : > { %v393_v54 = vpop.f32.mrb[10].mxu1 }
 0x2ea   : > { %v1187_v55 = vpop.f32.mrb[11].mxu1  ;;  %v397_v56 = vsel %vm166_vm2, %v396_v52, -inf }
 0x2eb   : > { %398 = vmax.xlane.f32.xlu0 %v397_v56 }
 0x2ef   : > { %v507_v57 = vpop.f32.mrb[12].mxu1 }
 0x2f0   : > { %v1198_v58 = vpop.f32.mrb[13].mxu1  ;;  %v513_v17 = vmul.f32 0.5, %v507_v57 }
 0x2f1   : > { %v510_v59 = vpop.f32.mrb[14].mxu1 }
 0x2f2   : > { %v1199_v60 = vpop.f32.mrb[15].mxu1  ;;  %v514_v20 = vsel %vm166_vm2, %v513_v17, -inf }
 0x2f4   : > { %641 = vrot.lane.b32.xlu1 %v1398_v2, %s1354_s30 }
 0x2f7   : > { %v624_v61 = vpop.f32.mrb[16].mxu1 }
 0x2f8   : > { %v1210_v62 = vpop.f32.mrb[17].mxu1  ;;  %v630_v19 = vmul.f32 0.5, %v624_v61 }
 0x2f9   : > { %v627_v63 = vpop.f32.mrb[18].mxu1 }
 0x2fa   : > { %v1211_v1 = vpop.f32.mrb[19].mxu1  ;;  %v631_v22 = vsel %vm166_vm2, %v630_v19, -inf }
 0x2ff   : > { %v741_v3 = vpop.f32.mrb[20].mxu1 }
 0x300   : > { %v1222_v4 = vpop.f32.mrb[21].mxu1  ;;  %v747_v21 = vmul.f32 0.5, %v741_v3 }
 0x301   : > { %524 = vrot.lane.b32.xlu0 %v1398_v2, %s1355_s2  ;;  %v744_v5 = vpop.f32.mrb[22].mxu1 }
 0x302   : > { %v1223_v6 = vpop.f32.mrb[23].mxu1  ;;  %v748_v24 = vsel %vm166_vm2, %v747_v21, -inf }
 0x307   : > { %v858_v7 = vpop.f32.mrb[24].mxu1 }
 0x308   : > { %v1234_v8 = vpop.f32.mrb[25].mxu1  ;;  %v864_v13 = vmul.f32 0.5, %v858_v7 }
 0x309   : > { %v861_v9 = vpop.f32.mrb[26].mxu1 }
 0x30a   : > { %v1235_v10 = vpop.f32.mrb[27].mxu1  ;;  %v865_v16 = vsel %vm166_vm2, %v864_v13, -inf }
 0x30b   : > { %v173_v10 = vsel %vm166_vm2, %v1427_v18, 0.0 }
 0x30f   : > { %v975_v11 = vpop.f32.mrb[28].mxu1 }
 0x310   : > { %v1246_v12 = vpop.f32.mrb[29].mxu1  ;;  %v981_v23 = vmul.f32 0.5, %v975_v11 }
 0x311   : > { %v978_v14 = vpop.f32.mrb[30].mxu1 }
 0x312   : > { %v1247_v15 = vpop.f32.mrb[31].mxu1  ;;  %v982_v25 = vsel %vm166_vm2, %v981_v23, -inf }
 0x318   : > { %866 = vmax.xlane.f32.xlu1 %v865_v16 }
 0x320   : > { %515 = vmax.xlane.f32.xlu0 %v514_v20 }
 0x324   : > { %632 = vmax.xlane.f32.xlu0 %v631_v22 }
 0x328   : > { %749 = vmax.xlane.f32.xlu0 %v748_v24 }
 0x329   : > { %875 = vrot.lane.b32.xlu1 %v1398_v2, %s1356_s3 }
 0x32c   : > { %983 = vmax.xlane.f32.xlu0 %v982_v25 }
 0x32d   : > { %992 = vrot.lane.b32.xlu1 %v1398_v2, %s1357_s4 }
 0x342   : > { %758 = vrot.lane.b32.xlu0 %v1398_v2, %s1358_s5 }
 0x370   : > { %v282_v26 = vpop.xlane.xlu1 %281 }
 0x371   : > { %v283_v27 = vsub.f32 %v279_v46, %v282_v26 }
 0x373   : > { %v284_v28 = vmul.f32 1.442695, %v283_v27 }
 0x374   : > { %v642_v42 = vpop.permute.xlu1 %641 }
 0x375   : > { %1296 = vpow2.f32 %v284_v28  ;;  %v647_v61 = vsel %vm182_vm3, %v642_v42, 0 }
 0x378   : > { %v399_v30 = vpop.xlane.xlu0 %398 }
 0x379   : > { %v400_v31 = vsub.f32 %v396_v52, %v399_v30 }
 0x37b   : > { %v401_v32 = vmul.f32 1.442695, %v400_v31 }
 0x37c   : > { %v525_v37 = vpop.permute.xlu0 %524 }
 0x37d   : > { %1298 = vpow2.f32 %v401_v32  ;;  %v530_v40 = vsel %vm182_vm3, %v525_v37, 0 }
 0x37f   : > { %v1297_v33 = vpop.eup %1296 }
 0x380   : > { %v286_v34 = vsel %vm166_vm2, %v1297_v33, 0.0  ;;  %v289_v35 = vpack.c.bf16 %v1297_v33, %v1297_v33 }
 0x381   : > { %287 = vadd.xlane.f32.xlu1 %v286_v34 }
 0x382   : > { %1179 = vmatmul.mubr.msk.bf16.vlgmr.msra.gmra.mrb[4].mxu0 %vm166_vm2, %v289_v35 }
 0x383   : > { %1189 = vmatpush3.bf16.msra.mxu0 %v413_v36  ;;  %1190 = vmatprep.mubr.msk.bf16.mxu0 %vm1335_vm0, %v1334_v0 }
 0x384   : > { %1200 = vmatprep.subr.bf16.mxu0 %v1334_v0 }
 0x387   : > { %v1299_v2 = vpop.eup %1298 }
 0x388   : > { %v403_v38 = vsel %vm166_vm2, %v1299_v2, 0.0  ;;  %v406_v39 = vpack.c.bf16 %v1299_v2, %v1299_v2 }
 0x389   : > { %404 = vadd.xlane.f32.xlu0 %v403_v38 }
 0x38a   : > { %1191 = vmatmul.mubr.msk.bf16.vlgmr.msra.gmra.mrb[8].mxu0 %vm166_vm2, %v406_v39 }
 0x38b   : > { %1201 = vmatpush3.bf16.msra.mxu0 %v530_v40  ;;  %1202 = vmatprep.mubr.msk.bf16.mxu0 %vm1335_vm0, %v1334_v0 }
 0x38c   : > { %1212 = vmatprep.subr.bf16.mxu0 %v1334_v0 }
 0x3a5   : > { %v867_v43 = vpop.xlane.xlu1 %866 }
 0x3a6   : > { %v868_v46 = vsub.f32 %v864_v13, %v867_v43 }
 0x3a8   : > { %v869_v50 = vmul.f32 1.442695, %v868_v46 }
 0x3a9   : > { %v876_v12 = vpop.permute.xlu1 %875 }
 0x3aa   : > { %v881_v13 = vsel %vm182_vm3, %v876_v12, 0 }
 0x3ad   : > { %v516_v44 = vpop.xlane.xlu0 %515  ;;  %v993_v15 = vpop.permute.xlu1 %992 }
 0x3ae   : > { %v517_v45 = vsub.f32 %v513_v17, %v516_v44  ;;  %v998_v18 = vsel %vm182_vm3, %v993_v15, 0 }
 0x3b0   : > { %v518_v47 = vmul.f32 1.442695, %v517_v45 }
 0x3b1   : > { %v633_v48 = vpop.xlane.xlu0 %632 }
 0x3b2   : > { %1300 = vpow2.f32 %v518_v47  ;;  %v634_v49 = vsub.f32 %v630_v19, %v633_v48 }
 0x3b4   : > { %v635_v51 = vmul.f32 1.442695, %v634_v49 }
 0x3b5   : > { %v750_v52 = vpop.xlane.xlu0 %749 }
 0x3b6   : > { %1302 = vpow2.f32 %v635_v51  ;;  %v751_v53 = vsub.f32 %v747_v21, %v750_v52 }
 0x3b7   : > { %1304 = vpow2.f32 %v869_v50 }
 0x3b8   : > { %v752_v54 = vmul.f32 1.442695, %v751_v53 }
 0x3b9   : > { %v984_v55 = vpop.xlane.xlu0 %983 }
 0x3ba   : > { %1306 = vpow2.f32 %v752_v54  ;;  %v985_v56 = vsub.f32 %v981_v23, %v984_v55 }
 0x3bc   : > { %v1301_v57 = vpop.eup %1300  ;;  %v986_v58 = vmul.f32 1.442695, %v985_v56 }
 0x3bd   : > { %v520_v59 = vsel %vm166_vm2, %v1301_v57, 0.0  ;;  %v523_v60 = vpack.c.bf16 %v1301_v57, %v1301_v57  ;;  %v759_v3 = vpop.permute.xlu0 %758 }
 0x3be   : > { %1308 = vpow2.f32 %v986_v58  ;;  %521 = vadd.xlane.f32.xlu1 %v520_v59  ;;  %v764_v5 = vsel %vm182_vm3, %v759_v3, 0 }
 0x3bf   : > { %1203 = vmatmul.mubr.msk.bf16.vlgmr.msra.gmra.mrb[12].mxu0 %vm166_vm2, %v523_v60 }
 0x3c0   : > { %v1303_v62 = vpop.eup %1302  ;;  %1213 = vmatpush3.bf16.msra.mxu0 %v647_v61  ;;  %1214 = vmatprep.mubr.msk.bf16.mxu0 %vm1335_vm0, %v1334_v0 }
 0x3c1   : > { %v637_v63 = vsel %vm166_vm2, %v1303_v62, 0.0  ;;  %1224 = vmatprep.subr.bf16.mxu0 %v1334_v0  ;;  %v1305_v1 = vpop.eup %1304  ;;  %v640_v8 = vpack.c.bf16 %v1303_v62, %v1303_v62 }
 0x3c2   : > { %638 = vadd.xlane.f32.xlu0 %v637_v63  ;;  %v871_v6 = vsel %vm166_vm2, %v1305_v1, 0.0  ;;  %v874_v16 = vpack.c.bf16 %v1305_v1, %v1305_v1 }
 0x3c4   : > { %v1307_v4 = vpop.eup %1306 }
 0x3c5   : > { %v754_v7 = vsel %vm166_vm2, %v1307_v4, 0.0  ;;  %v757_v14 = vpack.c.bf16 %v1307_v4, %v1307_v4 }
 0x3c6   : > { %872 = vadd.xlane.f32.xlu0 %v871_v6  ;;  %755 = vadd.xlane.f32.xlu1 %v754_v7 }
 0x3c7   : > { %1215 = vmatmul.mubr.msk.bf16.vlgmr.msra.gmra.mrb[16].mxu0 %vm166_vm2, %v640_v8 }
 0x3c8   : > { %v1309_v9 = vpop.eup %1308  ;;  %1225 = vmatpush3.bf16.msra.mxu0 %v764_v5  ;;  %1226 = vmatprep.mubr.msk.bf16.mxu0 %vm1335_vm0, %v1334_v0 }
 0x3c9   : > { %v988_v11 = vsel %vm166_vm2, %v1309_v9, 0.0  ;;  %1236 = vmatprep.subr.bf16.mxu0 %v1334_v0  ;;  %v991_v17 = vpack.c.bf16 %v1309_v9, %v1309_v9 }
 0x3ca   : > { %174 = vadd.xlane.f32.xlu0 %v173_v10  ;;  %989 = vadd.xlane.f32.xlu1 %v988_v11 }
 0x3cf   : > { %1227 = vmatmul.mubr.msk.bf16.vlgmr.msra.gmra.mrb[20].mxu0 %vm166_vm2, %v757_v14 }
 0x3d0   : > { %1237 = vmatpush3.bf16.msra.mxu0 %v881_v13  ;;  %1238 = vmatprep.mubr.msk.bf16.mxu0 %vm1335_vm0, %v1334_v0 }
 0x3d1   : > { %1248 = vmatprep.subr.bf16.mxu0 %v1334_v0 }
 0x3d7   : > { %1239 = vmatmul.mubr.msk.bf16.vlgmr.msra.gmra.mrb[24].mxu0 %vm166_vm2, %v874_v16 }
 0x3d8   : > { %1249 = vmatpush3.bf16.msra.mxu0 %v998_v18  ;;  %1250 = vmatprep.mubr.msk.bf16.mxu0 %vm1335_vm0, %v1334_v0 }
 0x3df   : > { %1251 = vmatmul.mubr.msk.bf16.vlgmr.msra.gmra.mrb[28].mxu0 %vm166_vm2, %v991_v17 }
 0x40e   : > { %v288_v19 = vpop.xlane.xlu1 %287 }
 0x40f   : > { %1310 = vrcp.f32 %v288_v19 }
 0x416   : > { %v405_v20 = vpop.xlane.xlu0 %404 }
 0x417   : > { %1312 = vrcp.f32 %v405_v20 }
 0x419   : > { %v1311_v23 = vpop.eup %1310 }
 0x421   : > { %v1313_v29 = vpop.eup %1312 }
 0x44b   : > { %v522_v2 = vpop.xlane.xlu1 %521 }
 0x44f   : > { %v639_v21 = vpop.xlane.xlu0 %638 }
 0x453   : > { %v873_v22 = vpop.xlane.xlu0 %872  ;;  %v756_v43 = vpop.xlane.xlu1 %755 }
 0x455   : > { %v332_v24 = vpop.f32.mrb[4].mxu0 }
 0x456   : > { %v339_v25 = vmul.f32 %v1311_v23, %v332_v24  ;;  %v1180_v26 = vpop.f32.mrb[5].mxu0 }
 0x457   : > { %v175_v27 = vpop.xlane.xlu0 %174  ;;  %v335_v28 = vpop.f32.mrb[6].mxu0 }
 0x458   : > { %341 = vrot.lane.b32.xlu1 %v339_v25, %s1359_s9  ;;  %1314 = vrcp.f32 %v175_v27  ;;  %v1181_v0 = vpop.f32.mrb[7].mxu0  ;;  %v990_v55 = vpop.xlane.xlu1 %989 }
 0x459   : > { %1316 = vrcp.f32 %v522_v2 }
 0x45a   : > { %1318 = vrcp.f32 %v639_v21 }
 0x45b   : > { %1320 = vrcp.f32 %v756_v43 }
 0x45c   : > { %1322 = vrcp.f32 %v873_v22 }
 0x45d   : > { %v449_v30 = vpop.f32.mrb[8].mxu0  ;;  %1324 = vrcp.f32 %v990_v55 }
 0x45e   : > { %v456_v31 = vmul.f32 %v1313_v29, %v449_v30  ;;  %v1192_v32 = vpop.f32.mrb[9].mxu0 }
 0x45f   : > { %v452_v33 = vpop.f32.mrb[10].mxu0 }
 0x460   : > { %458 = vrot.lane.b32.xlu0 %v456_v31, %s1360_s10  ;;  %v1193_v34 = vpop.f32.mrb[11].mxu0 }
 0x462   : > { %v1315_v35 = vpop.eup %1314 }
 0x463   : > { %v227_v36 = vmul.f32 %v1315_v35, %v1468_v41  ;;  %v1317_v37 = vpop.eup %1316 }
 0x464   : > { %v1319_v45 = vpop.eup %1318 }
 0x465   : > { %228 = vst.msk [vmem:[%s1526_s13] sm:$0xff] %vm118_vm1, %v227_v36  ;;  %v1321_v50 = vpop.eup %1320 }
 0x466   : > { %v1323_v57 = vpop.eup %1322 }
 0x467   : > { %v1325_v63 = vpop.eup %1324 }
 0x492   : > { %v566_v38 = vpop.f32.mrb[12].mxu0 }
 0x493   : > { %v573_v39 = vmul.f32 %v1317_v37, %v566_v38  ;;  %v1204_v40 = vpop.f32.mrb[13].mxu0 }
 0x494   : > { %v569_v42 = vpop.f32.mrb[14].mxu0 }
 0x495   : > { %575 = vrot.lane.b32.xlu1 %v573_v39, %s1361_s7  ;;  %v1205_v44 = vpop.f32.mrb[15].mxu0 }
 0x49a   : > { %v683_v46 = vpop.f32.mrb[16].mxu0 }
 0x49b   : > { %v690_v47 = vmul.f32 %v1319_v45, %v683_v46  ;;  %v1216_v48 = vpop.f32.mrb[17].mxu0 }
 0x49c   : > { %v686_v41 = vpop.f32.mrb[18].mxu0 }
 0x49d   : > { %692 = vrot.lane.b32.xlu1 %v690_v47, %s1362_s8  ;;  %v1217_v49 = vpop.f32.mrb[19].mxu0 }
 0x4a2   : > { %v800_v51 = vpop.f32.mrb[20].mxu0 }
 0x4a3   : > { %v807_v52 = vmul.f32 %v1321_v50, %v800_v51  ;;  %v1228_v53 = vpop.f32.mrb[21].mxu0 }
 0x4a4   : > { %v803_v54 = vpop.f32.mrb[22].mxu0 }
 0x4a5   : > { %809 = vrot.lane.b32.xlu1 %v807_v52, %s1363_s14  ;;  %v1229_v56 = vpop.f32.mrb[23].mxu0 }
 0x4aa   : > { %v917_v58 = vpop.f32.mrb[24].mxu0 }
 0x4ab   : > { %v924_v59 = vmul.f32 %v1323_v57, %v917_v58  ;;  %v1240_v60 = vpop.f32.mrb[25].mxu0 }
 0x4ac   : > { %v920_v61 = vpop.f32.mrb[26].mxu0 }
 0x4ad   : > { %926 = vrot.lane.b32.xlu0 %v924_v59, %s1364_s15  ;;  %v1241_v62 = vpop.f32.mrb[27].mxu0 }
 0x4b2   : > { %v1034_v1 = vpop.f32.mrb[28].mxu0 }
 0x4b3   : > { %v1041_v3 = vmul.f32 %v1325_v63, %v1034_v1  ;;  %v1252_v4 = vpop.f32.mrb[29].mxu0 }
 0x4b4   : > { %v1037_v5 = vpop.f32.mrb[30].mxu0 }
 0x4b5   : > { %1043 = vrot.lane.b32.xlu1 %v1041_v3, %s1365_s16  ;;  %v1253_v6 = vpop.f32.mrb[31].mxu0 }
 0x4ca   : > { %v342_v7 = vpop.permute.xlu1 %341 }
 0x4cb   : > { %345 = vst.msk [vmem:[%s1526_s13] sm:$0xff] %vm344_vm4, %v342_v7 }
 0x4d2   : > { %v459_v8 = vpop.permute.xlu0 %458 }
 0x4d3   : > { %462 = vst.msk [vmem:[%s1526_s13] sm:$0xff] %vm461_vm5, %v459_v8 }
 0x507   : > { %v576_v9 = vpop.permute.xlu1 %575 }
 0x508   : > { %579 = vst.msk [vmem:[%s1526_s13] sm:$0xff] %vm578_vm6, %v576_v9 }
 0x50f   : > { %v693_v10 = vpop.permute.xlu1 %692 }
 0x510   : > { %696 = vst.msk [vmem:[%s1526_s13] sm:$0xff] %vm695_vm7, %v693_v10 }
 0x517   : > { %v810_v11 = vpop.permute.xlu1 %809 }
 0x518   : > { %813 = vst.msk [vmem:[%s1526_s13] sm:$0xff] %vm812_vm8, %v810_v11 }
 0x51f   : > { %v927_v12 = vpop.permute.xlu0 %926 }
 0x520   : > { %930 = vst.msk [vmem:[%s1526_s13] sm:$0xff] %vm929_vm9, %v927_v12 }
 0x527   : > { %v1044_v13 = vpop.permute.xlu1 %1043 }
 0x528   : > { %1047 = vst.msk [vmem:[%s1526_s13] sm:$0xff] %vm1046_vm10, %v1044_v13 }
 0x529 PF: > { %s11_s6 = sadd.s32 1, %s1332_s6  }
 0x52a   : > { %p8_p4 = scmp.ge.s32.totalorder %s11_s6, 4  }
 0x52c   :  { %10 = sbr.rel (!%p8_p4) target bundleno = 1 (0x1), region = 54 }

// kernel: block_forward.12
= control target key start
LH: loop header
LB: loop body
LE: loop exit
PB: predicated region body
PF: predicated region fallthrough
CT: control target
= control target key end

     0   :  { %s431_s15 = smov 0   ;;  %s480_s0 = inlined_call_operand.vmem [shape: f32[2,8,32], index: 0, kind: input, shape index: {}]   ;;  %s481_s1 = inlined_call_operand.vmem [shape: f32[32,32], index: 1, kind: input, shape index: {}]   ;;  %s482_s2 = inlined_call_operand.vmem [shape: f32[1,32], index: 2, kind: input, shape index: {}]   ;;  %s483_s3 = inlined_call_operand.vmem [shape: f32[1,32], index: 3, kind: input, shape index: {}]   ;;  %s484_s4 = inlined_call_operand.vmem [shape: f32[2,8,32], index: 4, kind: output, shape index: {}]  }
   0x1 LB: > { %s356_s16 = sadd.s32 4294967295, %s402_s15   ;;  %p360_p0 = scmp.ge.s32.totalorder %s402_s15, 1  ;;  %s402_s15 = sphi %s431_s15, %s14_s15  }
   0x2   : > { %p161_p1 = scmp.lt.s32.totalorder %s402_s15, 3 }
   0x4   : > { %p162_p2 = pnand %p360_p0, %p161_p1 }
   0x5   : > { %vm195_vm0 = vcmask (!%p162_p2), 261120   ;;  %v206_v0 = vld [vmem:[%s481_s1] sm:$0xff] (!%p162_p2)  ;;  %v207_v1 = vld [vmem:[%s481_s1 + $0x8] sm:$0xff] (!%p162_p2)  ;;  %v404_v2 = vmov (!%p162_p2), 0.0   ;;  %vm405_vm1 = vmmov (!%p162_p2), 0   ;;  %p185_p3 = scmp.lt.s32.totalorder (!%p162_p2), %s356_s16, 1  ;;  %v267_v26 = vlaneseq (!%p162_p2) }
   0x6   : > { %165 = sbr.rel (%p162_p2) target bundleno = 590 (0x24e), region = 36  ;;  %372 = vmatprep.subr.bf16.mxu0 (!%p162_p2), %v404_v2  ;;  %v210_v3 = vpack.c.bf16 (!%p162_p2), %v207_v1, %v206_v0  ;;  %376 = vmatprep.mubr.msk.bf16.mxu0 (!%p162_p2), %vm405_vm1, %v404_v2  ;;  %v208_v4 = vld [vmem:[%s481_s1 + $0x10] sm:$0xff] (!%p162_p2)  ;;  %v209_v5 = vld [vmem:[%s481_s1 + $0x18] sm:$0xff] (!%p162_p2)  ;;  %v365_v42 = vld [vmem:[%s482_s2] ss:$0 sm:$0xff] (!%p162_p2) }
   0x7   : > { %v211_v7 = vpack.c.bf16 (!%p162_p2), %v209_v5, %v208_v4  ;;  %v268_v27 = vshrl.u32 (!%p162_p2), %v267_v26, 7  ;;  %v366_v44 = vld [vmem:[%s483_s3] ss:$0 sm:$0xff] (!%p162_p2) }
   0x8   : > { %v216_v6 = vsel (!%p162_p2), %vm195_vm0, %v210_v3, 0 }
   0x9   : > { %373 = vmatpush3.bf16.xpose.msra.mxu0 (!%p162_p2), %v216_v6  ;;  %v219_v10 = vsel (!%p162_p2), %vm195_vm0, %v211_v7, 0  ;;  %v269_v28 = vsub.s32 (!%p162_p2), 0, %v268_v27 }
   0xa   : > { %374 = vmatprep.subr.bf16.mxu0 (!%p162_p2), %v404_v2 }
   0xd   : > { %s486_s16 = smov (!%p185_p3, %s356_s16), 1 }
   0xe   : > { %s361_s25 = sshll.u32 %s486_s16, 3 }
   0xf   : > { %s188_s28 = scalar_lea.vmem %s480_s0, %s361_s25  ;;  %s192_s9 = scalar_lea.vmem %s484_s4, %s361_s25 }
  0x10   : > { %v194_v8 = vld [vmem:[%s188_s28] sm:$0xff] }
  0x11   : > { %v196_v9 = vsel %vm195_vm0, %v194_v8, 0.0  ;;  %375 = vmatpush3.bf16.xpose.msra.mxu0 %v219_v10 }
  0x12   : > { %v197_v11 = vrot.slane %v196_v9, 4 }
  0x14   : > { %v198_v12 = vadd.f32 %v197_v11, %v196_v9 }
  0x16   : > { %v199_v13 = vrot.slane %v198_v12, 2 }
  0x18   : > { %v200_v14 = vadd.f32 %v199_v13, %v198_v12 }
  0x1a   : > { %v201_v15 = vrot.slane %v200_v14, 1 }
  0x1c   : > { %v202_v16 = vadd.f32 %v201_v15, %v200_v14 }
  0x1e   : > { %v204_v17 = vmul.f32 0.125, %v202_v16 }
  0x20   : > { %v205_v18 = vpack.c.bf16 %v204_v17, %v204_v17 }
  0x22   : > { %377 = vmatmul.mubr.msk.bf16.vlgmr.msra.gmra.mrb[0].mxu0 %vm195_vm0, %v205_v18 }
  0xf5   : > { %v255_v19 = vpop.f32.mrb[0].mxu0 }
  0xf6   : > { %v364_v20 = vmul.f32 -1.442695, %v255_v19  ;;  %v378_v21 = vpop.f32.mrb[1].mxu0 }
  0xf7   : > { %v258_v22 = vpop.f32.mrb[2].mxu0 }
  0xf8   : > { %390 = vpow2.f32 %v364_v20  ;;  %v379_v23 = vpop.f32.mrb[3].mxu0 }
 0x102   : > { %v391_v24 = vpop.eup %390 }
 0x103   : > { %v264_v25 = vadd.f32 1.0, %v391_v24 }
 0x105   : > { %392 = vrcp.f32 %v264_v25 }
 0x10f   : > { %v393_v29 = vpop.eup %392 }
 0x110   : > { %v270_v30 = vrot.slane %v393_v29, %v269_v28 }
 0x112   : > { %v271_v31 = vmul.f32 %v270_v30, %v194_v8 }
 0x114   : > { %v272_v32 = vsel %vm195_vm0, %v271_v31, 0.0 }
 0x115   : > { %273 = vadd.xlane.f32.xlu0 %v272_v32 }
 0x1a2   : > { %v274_v33 = vpop.xlane.xlu0 %273 }
 0x1a3   : > { %v276_v34 = vmul.f32 0.03125, %v274_v33 }
 0x1a5   : > { %v277_v35 = vsub.f32 %v271_v31, %v276_v34 }
 0x1a7   : > { %v278_v36 = vmul.f32 %v277_v35, %v277_v35 }
 0x1a9   : > { %v279_v37 = vsel %vm195_vm0, %v278_v36, 0.0 }
 0x1aa   : > { %280 = vadd.xlane.f32.xlu0 %v279_v37 }
 0x237   : > { %v281_v38 = vpop.xlane.xlu0 %280 }
 0x238   : > { %v282_v39 = vmul.f32 0.03125, %v281_v38 }
 0x23a   : > { %v283_v40 = vadd.f32 1e-05, %v282_v39 }
 0x23c   : > { %394 = vrsqrt.f32 %v283_v40 }
 0x246   : > { %v395_v41 = vpop.eup %394 }
 0x247   : > { %v285_v43 = vmul.f32 %v395_v41, %v277_v35 }
 0x249   : > { %v293_v45 = vmul.f32 %v365_v42, %v285_v43 }
 0x24b   : > { %v301_v46 = vadd.f32 %v366_v44, %v293_v45 }
 0x24d   : > { %302 = vst.msk [vmem:[%s192_s9] sm:$0xff] %vm195_vm0, %v301_v46 }
 0x24e PF: > { %s14_s15 = sadd.s32 1, %s402_s15  }
 0x24f   : > { %p11_p4 = scmp.ge.s32.totalorder %s14_s15, 4  }
 0x251   :  { %13 = sbr.rel (!%p11_p4) target bundleno = 1 (0x1), region = 66 }

// kernel: block_forward.14
= control target key start
LH: loop header
LB: loop body
LE: loop exit
PB: predicated region body
PF: predicated region fallthrough
CT: control target
= control target key end

     0   :  { %v111_v0 = vmov 0.0   ;;  %vm34_vm0 = vcmask 523264   ;;  %vm112_vm1 = vmmov 0   ;;  %vm89_vm2 = vcmask 261120   ;;  %s174_s1 = inlined_call_operand.vmem [shape: f32[32,64], index: 1, kind: input, shape index: {}]   ;;  %s175_s0 = inlined_call_operand.vmem [shape: f32[16,64], index: 0, kind: input, shape index: {}]   ;;  %s176_s2 = inlined_call_operand.vmem [shape: f32[1,32], index: 2, kind: input, shape index: {}]   ;;  %s177_s3 = inlined_call_operand.vmem [shape: f32[16,32], index: 3, kind: input, shape index: {}]   ;;  %s178_s4 = inlined_call_operand.vmem [shape: f32[16,32], index: 4, kind: output, shape index: {}]  }
   0x1   :  { %101 = vmatprep.subr.bf16.mxu0 %v111_v0  ;;  %v21_v1 = vld [vmem:[%s174_s1] sm:$0xff]  ;;  %v22_v2 = vld [vmem:[%s174_s1 + $0x8] sm:$0xff]  ;;  %105 = vmatprep.mubr.msk.bf16.mxu0 %vm112_vm1, %v111_v0  ;;  %v23_v4 = vld [vmem:[%s174_s1 + $0x10] sm:$0xff] }
   0x2   :  { %v25_v3 = vpack.c.bf16 %v22_v2, %v21_v1  ;;  %v24_v5 = vld [vmem:[%s174_s1 + $0x18] sm:$0xff]  ;;  %v18_v9 = vld [vmem:[%s175_s0] sm:$0xff]  ;;  %v19_v10 = vld [vmem:[%s175_s0 + $0x8] sm:$0xff] }
   0x3   :  { %v26_v7 = vpack.c.bf16 %v24_v5, %v23_v4  ;;  %v20_v11 = vpack.c.bf16 %v19_v10, %v18_v9  ;;  %v96_v12 = vld [vmem:[%s176_s2] ss:$0 sm:$0xff]  ;;  %v86_v18 = vld [vmem:[%s177_s3 + $0x8] sm:$0xff] }
   0x4   :  { %v39_v6 = vsel %vm34_vm0, %v25_v3, 0  ;;  %v85_v14 = vld [vmem:[%s177_s3] sm:$0xff] }
   0x5   :  { %102 = vmatpush3.bf16.xpose.msra.mxu0 %v39_v6  ;;  %v42_v8 = vsel %vm34_vm0, %v26_v7, 0 }
   0x6   :  { %103 = vmatprep.subr.bf16.mxu0 %v111_v0 }
   0xd   :  { %104 = vmatpush3.bf16.xpose.msra.mxu0 %v42_v8 }
  0x14   :  { %106 = vmatmul.mubr.msk.bf16.vlgmr.msra.gmra.mrb[0].mxu0 %vm34_vm0, %v20_v11 }
  0xe7   :  { %v78_v13 = vpop.f32.mrb[0].mxu0 }
  0xe8   :  { %v79_v15 = vadd.f32 %v96_v12, %v78_v13  ;;  %v107_v16 = vpop.f32.mrb[1].mxu0 }
  0xe9   :  { %v81_v17 = vpop.f32.mrb[2].mxu0 }
  0xea   :  { %v87_v19 = vadd.f32 %v85_v14, %v79_v15  ;;  %v82_v20 = vadd.f32 %v96_v12, %v81_v17  ;;  %v108_v21 = vpop.f32.mrb[3].mxu0 }
  0xec   :  { %90 = vst.msk [vmem:[%s178_s4] sm:$0xff] %vm89_vm2, %v87_v19  ;;  %v88_v22 = vadd.f32 %v86_v18, %v82_v20 }
  0xee   :  { %91 = vst.msk [vmem:[%s178_s4 + $0x8] sm:$0xff] %vm89_vm2, %v88_v22 }

// kernel: block_forward.13
= control target key start
LH: loop header
LB: loop body
LE: loop exit
PB: predicated region body
PF: predicated region fallthrough
CT: control target
= control target key end

     0   :  { %v144_v0 = vmov 0.0   ;;  %vm37_vm0 = vcmask 261120   ;;  %vm145_vm1 = vmmov 0   ;;  %vm112_vm2 = vcmask 523264   ;;  %s210_s1 = inlined_call_operand.vmem [shape: f32[64,32], index: 1, kind: input, shape index: {}]   ;;  %s211_s0 = inlined_call_operand.vmem [shape: f32[16,32], index: 0, kind: input, shape index: {}]   ;;  %s212_s2 = inlined_call_operand.vmem [shape: f32[1,64], index: 2, kind: input, shape index: {}]   ;;  %s213_s3 = inlined_call_operand.vmem [shape: f32[16,64], index: 3, kind: output, shape index: {}]  }
   0x1   :  { %126 = vmatprep.subr.bf16.mxu0 %v144_v0  ;;  %v18_v1 = vld [vmem:[%s210_s1] sm:$0xff]  ;;  %v19_v2 = vld [vmem:[%s210_s1 + $0x8] sm:$0xff]  ;;  %134 = vmatprep.mubr.msk.bf16.mxu0 %vm145_vm1, %v144_v0  ;;  %v20_v4 = vld [vmem:[%s210_s1 + $0x10] sm:$0xff] }
   0x2   :  { %v26_v3 = vpack.c.bf16 %v19_v2, %v18_v1  ;;  %v21_v5 = vld [vmem:[%s210_s1 + $0x18] sm:$0xff]  ;;  %v22_v9 = vld [vmem:[%s210_s1 + $0x20] sm:$0xff]  ;;  %v23_v10 = vld [vmem:[%s210_s1 + $0x28] sm:$0xff] }
   0x3   :  { %v27_v7 = vpack.c.bf16 %v21_v5, %v20_v4  ;;  %v28_v11 = vpack.c.bf16 %v23_v10, %v22_v9  ;;  %v24_v13 = vld [vmem:[%s210_s1 + $0x30] sm:$0xff]  ;;  %v25_v14 = vld [vmem:[%s210_s1 + $0x38] sm:$0xff]  ;;  %v15_v17 = vld [vmem:[%s211_s0] sm:$0xff] }
   0x4   :  { %v42_v6 = vsel %vm37_vm0, %v26_v3, 0  ;;  %v29_v15 = vpack.c.bf16 %v25_v14, %v24_v13  ;;  %v16_v18 = vld [vmem:[%s211_s0 + $0x8] sm:$0xff]  ;;  %v119_v20 = vld [vmem:[%s212_s2] ss:$0 sm:$0xff] }
   0x5   :  { %127 = vmatpush3.bf16.xpose.msra.mxu0 %v42_v6  ;;  %v45_v8 = vsel %vm37_vm0, %v27_v7, 0  ;;  %v48_v12 = vsel %vm37_vm0, %v28_v11, 0  ;;  %v17_v19 = vpack.c.bf16 %v16_v18, %v15_v17 }
   0x6   :  { %128 = vmatprep.subr.bf16.mxu0 %v144_v0  ;;  %v51_v16 = vsel %vm37_vm0, %v29_v15, 0 }
   0xd   :  { %129 = vmatpush3.bf16.xpose.msra.mxu0 %v45_v8 }
   0xe   :  { %130 = vmatprep.subr.bf16.mxu0 %v144_v0 }
  0x15   :  { %131 = vmatpush3.bf16.xpose.msra.mxu0 %v48_v12 }
  0x16   :  { %132 = vmatprep.subr.bf16.mxu0 %v144_v0 }
  0x1d   :  { %133 = vmatpush3.bf16.xpose.msra.mxu0 %v51_v16 }
  0x24   :  { %135 = vmatmul.mubr.msk.bf16.vlgmr.msra.gmra.mrb[0].mxu0 %vm37_vm0, %v17_v19 }
  0xf7   :  { %v87_v21 = vpop.f32.mrb[0].mxu0 }
  0xf8   :  { %v88_v22 = vadd.f32 %v119_v20, %v87_v21  ;;  %v136_v23 = vpop.f32.mrb[1].mxu0 }
  0xf9   :  { %v90_v24 = vpop.f32.mrb[2].mxu0 }
  0xfa   :  { %v96_v25 = vmul.f32 0.044715, %v88_v22  ;;  %v91_v26 = vadd.f32 %v119_v20, %v90_v24  ;;  %v137_v27 = vpop.f32.mrb[3].mxu0  ;;  %v94_v38 = vmul.f32 0.5, %v88_v22 }
  0xfc   :  { %v98_v28 = vmul.f32 %v96_v25, %v88_v22  ;;  %v97_v29 = vmul.f32 0.044715, %v91_v26  ;;  %v95_v42 = vmul.f32 0.5, %v91_v26 }
  0xfe   :  { %v100_v30 = vmul.f32 %v98_v28, %v88_v22  ;;  %v99_v31 = vmul.f32 %v97_v29, %v91_v26 }
 0x100   :  { %v102_v32 = vadd.f32 %v100_v30, %v88_v22  ;;  %v101_v33 = vmul.f32 %v99_v31, %v91_v26 }
 0x102   :  { %v104_v34 = vmul.f32 0.7978846, %v102_v32  ;;  %v103_v35 = vadd.f32 %v101_v33, %v91_v26 }
 0x104   :  { %140 = vtanh.f32 %v104_v34  ;;  %v105_v36 = vmul.f32 0.7978846, %v103_v35 }
 0x106   :  { %142 = vtanh.f32 %v105_v36 }
 0x10e   :  { %v141_v37 = vpop.eup %140 }
 0x10f   :  { %v108_v39 = vadd.f32 1.0, %v141_v37 }
 0x110   :  { %v143_v40 = vpop.eup %142 }
 0x111   :  { %v110_v41 = vmul.f32 %v108_v39, %v94_v38  ;;  %v109_v43 = vadd.f32 1.0, %v143_v40 }
 0x113   :  { %113 = vst.msk [vmem:[%s213_s3] sm:$0xff] %vm112_vm2, %v110_v41  ;;  %v111_v44 = vmul.f32 %v109_v43, %v95_v42 }
 0x115   :  { %114 = vst.msk [vmem:[%s213_s3 + $0x8] sm:$0xff] %vm112_vm2, %v111_v44 }

// kernel: block_forward.15
= control target key start
LH: loop header
LB: loop body
LE: loop exit
PB: predicated region body
PF: predicated region fallthrough
CT: control target
= control target key end

     0   :  { %7 = vsyncpa [#allocation3], 0  ;;  %s559_s0 = inlined_call_operand.vmem [shape: f32[2,8,32], index: 0, kind: input, shape index: {}]   ;;  %s560_s1 = inlined_call_operand.vmem [shape: f32[32,32], index: 1, kind: input, shape index: {}]   ;;  %s561_s2 = inlined_call_operand.hbm [shape: f32[2,8,32], index: 2, kind: output, shape index: {}]  }
   0x1   :  { %9 = vsyncpa [#allocation3 + $0x1], 0  ;;  %s442_s9 = smov 0   ;;  %s444_s10 = smov 0  }
   0x2   :  { %s446_s11 = smov 0   ;;  %s448_s12 = smov 0  }
   0x3 LB: > { %s463_s13 = sadd.s32 4294967295, %s422_s12   ;;  %s292_s14 = sadd.s32 4294967294, %s422_s12   ;;  %s422_s12 = sphi %s448_s12, %s567_s12   ;;  %s418_s11 = sphi %s446_s11, %s566_s11   ;;  %s414_s10 = sphi %s444_s10, %s565_s10   ;;  %s410_s9 = sphi %s442_s9, %s564_s9  }
   0x4   : > { %s467_s15 = sadd.s32 1, %s422_s12   ;;  %s69_s16 = sadd.s32 1, %s418_s11 }
   0x5   : > { %s66_s17 = ssub.s32 %s422_s12, %s467_s15  ;;  %p79_p0 = scmp.ne.s32.totalorder %s418_s11, %s414_s10 }
   0x6   : > { %p67_p1 = scmp.eq.s32.totalorder %s66_s17, 0  ;;  %p80_p2 = scmp.eq.s32.totalorder %s463_s13, 1 }
   0x7   : > { %p85_p3 = scmp.ne.s32.totalorder %s414_s10, %s410_s9  ;;  %p86_p4 = scmp.eq.s32.totalorder %s292_s14, 1 }
   0x8   : > { %s478_s18 = scalar_select %p67_p1, %s418_s11, %s69_s16  }
   0x9   : > { %p480_p5 = por %p80_p2, %p79_p0  ;;  %p484_p6 = por %p86_p4, %p85_p3 }
   0xa   : > { %p295_p7 = scmp.ge.s32.totalorder %s422_s12, 1  ;;  %p114_p8 = scmp.lt.s32.totalorder %s422_s12, 3 }
   0xc   : > { %p115_p9 = pnand %p295_p7, %p114_p8 }
   0xd   : > { %p135_p10 = scmp.lt.s32.totalorder (!%p115_p9), %s463_s13, 1  ;;  %vm141_vm0 = vcmask (!%p115_p9), 261120   ;;  %v152_v0 = vld [vmem:[%s560_s1] sm:$0xff] (!%p115_p9)  ;;  %v153_v1 = vld [vmem:[%s560_s1 + $0x8] sm:$0xff] (!%p115_p9)  ;;  %v424_v2 = vmov (!%p115_p9), 0.0   ;;  %v154_v4 = vld [vmem:[%s560_s1 + $0x10] sm:$0xff] (!%p115_p9)  ;;  %v213_v26 = vlaneseq (!%p115_p9) }
   0xe   : > { %118 = sbr.rel (%p115_p9) target bundleno = 299 (0x12b), region = 28  ;;  %307 = vmatprep.subr.bf16.mxu0 (!%p115_p9), %v424_v2  ;;  %v156_v3 = vpack.c.bf16 (!%p115_p9), %v153_v1, %v152_v0  ;;  %v155_v5 = vld [vmem:[%s560_s1 + $0x18] sm:$0xff] (!%p115_p9)  ;;  %vm425_vm1 = vmmov (!%p115_p9), 0   ;;  %s132_s6 = sand.u32 (!%p115_p9), 1, %s414_s10  }
   0xf   : > { %311 = vmatprep.mubr.msk.bf16.mxu0 (!%p115_p9), %vm425_vm1, %v424_v2  ;;  %v157_v7 = vpack.c.bf16 (!%p115_p9), %v155_v5, %v154_v4  ;;  %v214_v27 = vshrl.u32 (!%p115_p9), %v213_v26, 7  ;;  %s296_s7 = sshll.u32 (!%p115_p9), %s132_s6, 3  ;;  %s301_s8 = sshll.u32 (!%p115_p9), %s463_s13, 7 }
  0x10   : > { %v162_v6 = vsel (!%p115_p9), %vm141_vm0, %v156_v3, 0  ;;  %s134_s14 = scalar_lea.vmem (!%p115_p9), [#allocation2], %s296_s7  ;;  %s516_s22 = scalar_lea.hbm (!%p115_p9), %s561_s2, %s301_s8 }
  0x11   : > { %308 = vmatpush3.bf16.xpose.msra.mxu0 (!%p115_p9), %v162_v6  ;;  %v165_v11 = vsel (!%p115_p9), %vm141_vm0, %v157_v7, 0  ;;  %v215_v28 = vsub.s32 (!%p115_p9), 0, %v214_v27  ;;  %s233_s16 = sshll.u32 (!%p115_p9), %s134_s14, 4  ;;  %s220_s23 = scalar_lea.sflag (!%p115_p9), [#allocation3], %s132_s6  ;;  %s518_s16 = int_to_ptr.vmem [resolvable:$true] %s233_s16 }
  0x12   : > { %309 = vmatprep.subr.bf16.mxu0 (!%p115_p9), %v424_v2  ;;  %s360_s24 = scalar_lea.vmem (!%p115_p9), %s518_s16, 128 }
  0x13   : > { %p361_p11 = scmp.ne.s32.totalorder (!%p115_p9), %s518_s16, %s360_s24 }
  0x15   : > { %s136_s25 = scalar_select %p135_p10, %s463_s13, 1 }
  0x16   : > { %p362_p12 = pnand %p361_p11, %p480_p5  ;;  %s426_s13 = smov [#allocation2]  }
  0x17   : > { %s297_s30 = sshll.u32 %s136_s25, 3  ;;  %s364_s25 = sshll.u32 %s426_s13, 4  ;;  %s365_s25 = int_to_ptr.vmem [resolvable:$false] %s364_s25 }
  0x18   : > { %s138_s5 = scalar_lea.vmem %s559_s0, %s297_s30  ;;  %p363_p13 = pneg %p362_p12 }
  0x19   : > { %v140_v8 = vld [vmem:[%s138_s5] sm:$0xff]  ;;  %310 = vmatpush3.bf16.xpose.msra.mxu0 %v165_v11  ;;  %s366_s26 = scalar_lea.vmem %s365_s25, 256  ;;  %p367_p0 = scmp.lt.s32.totalorder %s518_s16, %s365_s25 }
  0x1a   : > { %v142_v9 = vsel %vm141_vm0, %v140_v8, 0.0  ;;  %p368_p1 = scmp.lt.s32.totalorder %s366_s26, %s360_s24 }
  0x1b   : > { %v143_v10 = vrot.slane %v142_v9, 4 }
  0x1c   : > { %p369_p2 = por %p368_p1, %p367_p0 }
  0x1d   : > { %v144_v12 = vadd.f32 %v143_v10, %v142_v9 }
  0x1e   : > { %p370_p3 = pnand %p369_p2, %p363_p13 }
  0x1f   : > { %v145_v13 = vrot.slane %v144_v12, 2 }
  0x21   : > { %v146_v14 = vadd.f32 %v145_v13, %v144_v12 }
  0x23   : > { %v147_v15 = vrot.slane %v146_v14, 1 }
  0x25   : > { %v148_v16 = vadd.f32 %v147_v15, %v146_v14 }
  0x27   : > { %v150_v17 = vmul.f32 0.125, %v148_v16 }
  0x29   : > { %v151_v18 = vpack.c.bf16 %v150_v17, %v150_v17 }
  0x2b   : > { %312 = vmatmul.mubr.msk.bf16.vlgmr.msra.gmra.mrb[0].mxu0 %vm141_vm0, %v151_v18 }
  0xfe   : > { %v201_v19 = vpop.f32.mrb[0].mxu0 }
  0xff   : > { %v299_v20 = vmul.f32 -1.442695, %v201_v19  ;;  %v313_v21 = vpop.f32.mrb[1].mxu0 }
 0x100   : > { %v204_v22 = vpop.f32.mrb[2].mxu0 }
 0x101   : > { %356 = vpow2.f32 %v299_v20  ;;  %v314_v23 = vpop.f32.mrb[3].mxu0 }
 0x10b   : > { %v357_v24 = vpop.eup %356 }
 0x10c   : > { %v210_v25 = vadd.f32 1.0, %v357_v24 }
 0x10e   : > { %358 = vrcp.f32 %v210_v25 }
 0x118   : > { %v359_v29 = vpop.eup %358 }
 0x119   : > { %v216_v30 = vrot.slane %v359_v29, %v215_v28 }
 0x11b   : > { %v217_v31 = vmul.f32 %v216_v30, %v140_v8 }
 0x11d   : > { %218 = vst.msk [vmem:[%s134_s14] sm:$0xff] %vm141_vm0, %v217_v31 }
 0x11e   : > { %373 = shalt.err (!%p370_p3)
}
 0x11f   : > { %s374_s27 = scalar_lea.hbm %s516_s22, 128  ;;  %s378_s30 = scalar_lea.hbm %s561_s2, 256 }
 0x120   : > { %p375_p4 = scmp.ne.s32.totalorder %s516_s22, %s374_s27  ;;  %p379_p9 = scmp.lt.u32.totalorder %s516_s22, %s561_s2 }
 0x121   : > { %p380_p10 = scmp.lt.u32.totalorder %s378_s30, %s374_s27  ;;  %p382_p12 = scmp.lt.u32.totalorder %s374_s27, %s516_s22 }
 0x122   : > { %p376_p7 = pnand %p375_p4, %p480_p5 }
 0x123   : > { %p381_p11 = por %p380_p10, %p379_p9 }
 0x124   : > { %p377_p8 = pneg %p376_p7 }
 0x125   : > { %p383_p13 = por %p382_p12, %p381_p11 }
 0x127   : > { %p384_p0 = pnand %p383_p13, %p377_p8 }
 0x129   : > { %387 = shalt.err (!%p384_p0)
}
 0x12a   : > { %315 = dma.vmem_to_hbm [thread:$0]  (%p480_p5), %s518_s16, 128, %s516_s22, %s220_s23  }
 0x12b PF: > { %p321_p1 = scmp.ge.s32.totalorder %s422_s12, 2  ;;  %s245_s5 = sand.u32 1, %s410_s9  }
 0x12c   : > { %s246_s6 = scalar_lea.sflag [#allocation3], %s245_s5 }
 0x12d   : > { %p318_p2 = pnand %p321_p1, %p484_p6 }
 0x12f   : > { %405 = dma.done.wait (!%p318_p2), %s246_s6, 128  }
 0x130   : > { %407 = vsyncadd (!%p318_p2), %s246_s6, 4294967168  ;;  %p12_p3 = scmp.ge.s32.totalorder %s467_s15, 4   ;;  %s564_s9 = smov %s414_s10 }
 0x131   : > { %s565_s10 = smov %s418_s11  ;;  %s566_s11 = smov %s478_s18 }
 0x132   : > { %s567_s12 = smov %s467_s15  ;;  %14 = sbr.rel (!%p12_p3) target bundleno = 3 (0x3), region = 63 }
 0x139   :  { %251 = vsyncpa [#allocation3], 1 }
 0x13a   :  { %253 = vsyncpa [#allocation3 + $0x1], 1 }

</bundles_post_ra>
